<compile_context>
chip_gen: v6e
topology: v6e:2x2x1
jax: 0.10.0
libtpu: 0.0.40
codegen_flags: <defaults>
</compile_context>

<pallas_src>
import jax
import jax.numpy as jnp
from jax.experimental import pallas as pl
from jax.experimental.pallas import tpu as pltpu

LATENT_DIMS = 4
H = W = 20
HW = H * W          # 400 flat spatial positions (p = i*W + j)
PAD = 512           # HW rounded up to a lane multiple (4 * 128)
BN_EPS = 1e-5


def _lane_shift(v, s):
    """out[..., p] = v[..., (p + s) mod PAD]  (XLU lane rotation)."""
    return pltpu.roll(v, (-s) % PAD, axis=1)


def _encoder_kernel(scal_ref, x_ref, wh_ref, noise_ref, z_ref):
    """Fused Encoder forward on a lane-dense (B, 512) flat-spatial layout.

    scal_ref : (44,) SMEM f32 -- per conv k: [w00..w22 (9), conv bias, bn gamma,
               bn beta] (3*12 = 36), then packed head bias [b_mu | b_sigma] (8).
    x_ref    : (B, PAD) VMEM  -- flattened 20x20 image, lanes [400:512) are zero.
    wh_ref   : (8, PAD) VMEM  -- [W_mu ; W_sigma] rows, flat spatial, zero padded.
    noise_ref: (B, 4)   VMEM  -- standard-normal sample.
    z_ref    : (B, 4)   VMEM  -- z = mu + sigma * noise.
    """
    x = x_ref[...]
    B = x.shape[0]
    inv_n = 1.0 / (B * HW)

    # Boundary masks, built once (flat index p = W*i + j).
    p = jax.lax.broadcasted_iota(jnp.int32, (1, PAD), 1)
    col = jax.lax.rem(p, W)
    m_valid = (p < HW).astype(jnp.float32)          # real (non-pad) positions
    m_coll = (col != 0).astype(jnp.float32)         # neighbor j-1 exists
    m_colr = (col != W - 1).astype(jnp.float32)     # neighbor j+1 exists
    m_rowu = (p >= W).astype(jnp.float32)           # neighbor row i-1 exists
    m_rowd = (p < HW - W).astype(jnp.float32)       # neighbor row i+1 exists

    def conv3x3(v, k):
        # nn.Conv2d(1,1,3,padding=1) cross-correlation on the flat layout.
        w = [scal_ref[12 * k + t] for t in range(9)]
        bias = scal_ref[12 * k + 9]
        vm = _lane_shift(v, -1) * m_coll            # x[., i, j-1]
        vp = _lane_shift(v, +1) * m_colr            # x[., i, j+1]
        r_up = w[0] * vm + w[1] * v + w[2] * vp     # kernel row di = -1
        r_mid = w[3] * vm + w[4] * v + w[5] * vp    # kernel row di =  0
        r_dn = w[6] * vm + w[7] * v + w[8] * vp     # kernel row di = +1
        out = (r_mid + bias
               + _lane_shift(r_up, -W) * m_rowu     # row i-1 contribution
               + _lane_shift(r_dn, +W) * m_rowd)    # row i+1 contribution
        return out * m_valid                        # keep pad lanes exactly 0

    def bn_relu(v, k):
        # BatchNorm2d(1) training mode: batch stats over (N,H,W), biased var.
        gamma = scal_ref[12 * k + 10]
        beta = scal_ref[12 * k + 11]
        s1 = jnp.sum(v)                             # pads are zero -> exact sums
        s2 = jnp.sum(v * v)
        mean = s1 * inv_n
        var = s2 * inv_n - mean * mean
        scale = jax.lax.rsqrt(var + BN_EPS) * gamma
        shift = beta - mean * scale
        return jnp.maximum(v * scale + shift, 0.0) * m_valid

    t = bn_relu(conv3x3(x, 0), 0)                   # net1: conv -> bn -> relu
    t = bn_relu(conv3x3(t, 1), 1)                   # net1: conv -> bn -> relu
    h1 = t + x                                      # residual: net1(xy) + xy
    h = bn_relu(conv3x3(h1, 2), 2)                  # net2: conv -> bn -> relu

    # Head: per-channel VPU multiply + lane reduction (8 channels unrolled);
    # no materialized (B, 8, HW) product, no MXU round trip at tiny B.
    nz = noise_ref[...]
    z_cols = []
    for c in range(LATENT_DIMS):
        w_mu_c = wh_ref[c:c + 1, :]                                  # (1, PAD)
        w_ls_c = wh_ref[LATENT_DIMS + c:LATENT_DIMS + c + 1, :]      # (1, PAD)
        mu_c = (jnp.sum(h * w_mu_c, axis=1, keepdims=True)
                + scal_ref[36 + c])
        ls_c = (jnp.sum(h * w_ls_c, axis=1, keepdims=True)
                + scal_ref[36 + LATENT_DIMS + c])
        z_cols.append(mu_c + jnp.exp(ls_c) * nz[:, c:c + 1])
    z_ref[...] = jnp.concatenate(z_cols, axis=1)


def pack_params(params):
    """One-time parameter preprocessing -- hoisted out of the forward pass."""
    conv_scal = jnp.concatenate(
        [params["conv_w"].reshape(3, 9),
         params["conv_b"][:, None],
         params["bn_gamma"][:, None],
         params["bn_beta"][:, None]], axis=1).astype(jnp.float32).reshape(-1)   # (36,)
    b_head = jnp.concatenate([params["b_mu"], params["b_sig"]]).astype(jnp.float32)  # (8,)
    scal = jnp.concatenate([conv_scal, b_head])                                 # (44,)
    w_head = jnp.concatenate([params["w_mu"], params["w_sig"]], axis=0)          # (8, 400)
    w_head = jnp.pad(w_head, ((0, 0), (0, PAD - HW))).astype(jnp.float32)        # (8, 512)
    return {"scal": scal, "w_head": w_head}


@jax.jit
def encoder_forward(x_nchw, packed, noise):
    B = x_nchw.shape[0]
    # Layout plumbing only: flatten NCHW (C=1) spatial and zero-pad to 512 lanes.
    x_flat = x_nchw.reshape(B, -1).astype(jnp.float32)          # (B, 400)
    x_pad = jnp.pad(x_flat, ((0, 0), (0, PAD - HW)))            # (B, 512)

    flops = B * PAD * (3 * 30 + 3 * 8) + 2 * B * PAD * 2 * LATENT_DIMS
    bytes_accessed = 4 * (B * PAD + 8 * PAD + 44
                          + B * LATENT_DIMS + B * LATENT_DIMS)

    return pl.pallas_call(
        _encoder_kernel,
        out_shape=jax.ShapeDtypeStruct((B, LATENT_DIMS), jnp.float32),
        in_specs=[
            pl.BlockSpec(memory_space=pltpu.MemorySpace.SMEM),   # packed scalars (44,)
            pl.BlockSpec(memory_space=pltpu.MemorySpace.VMEM),   # x flat (B, 512)
            pl.BlockSpec(memory_space=pltpu.MemorySpace.VMEM),   # head weights (8, 512)
            pl.BlockSpec(memory_space=pltpu.MemorySpace.VMEM),   # noise (B, 4)
        ],
        out_specs=pl.BlockSpec(memory_space=pltpu.MemorySpace.VMEM),
        cost_estimate=pl.CostEstimate(
            flops=flops,
            transcendentals=3 + B * LATENT_DIMS,
            bytes_accessed=bytes_accessed),
    )(packed["scal"], x_pad, packed["w_head"], noise)


def _reference(x_nchw, params, noise):
    """Pure-JAX reference matching the PyTorch forward semantics."""
    x = x_nchw[:, 0].astype(jnp.float32)

    def conv(v, w, b):
        p = jnp.pad(v, ((0, 0), (1, 1), (1, 1)))
        acc = jnp.zeros_like(v) + b
        for di in range(3):
            for dj in range(3):
                acc = acc + w[di, dj] * p[:, di:di + H, dj:dj + W]
        return acc

    def bn_relu(v, g, be):
        m = v.mean()
        var = ((v - m) ** 2).mean()
        return jnp.maximum((v - m) / jnp.sqrt(var + BN_EPS) * g + be, 0.0)

    cw, cb = params["conv_w"], params["conv_b"]
    gg, bb = params["bn_gamma"], params["bn_beta"]
    t = bn_relu(conv(x, cw[0], cb[0]), gg[0], bb[0])
    t = bn_relu(conv(t, cw[1], cb[1]), gg[1], bb[1])
    h1 = t + x
    hh = bn_relu(conv(h1, cw[2], cb[2]), gg[2], bb[2])
    flat = hh.reshape(x.shape[0], -1)
    mu = flat @ params["w_mu"].T + params["b_mu"]
    sigma = jnp.exp(flat @ params["w_sig"].T + params["b_sig"])
    return mu + sigma * noise


if __name__ == "__main__":
    key = jax.random.PRNGKey(0)
    k = jax.random.split(key, 10)
    B = 2

    x = jax.random.normal(k[0], (B, 1, H, W), jnp.float32)

    # Deterministic synthetic parameters (shapes from Encoder.__init__).
    params = dict(
        conv_w=0.3 * jax.random.normal(k[1], (3, 3, 3), jnp.float32),   # 3 convs, 3x3, 1->1 ch
        conv_b=0.1 * jax.random.normal(k[2], (3,), jnp.float32),
        bn_gamma=(1.0 + 0.1 * jax.random.normal(k[3], (3,), jnp.float32)),
        bn_beta=0.1 * jax.random.normal(k[4], (3,), jnp.float32),
        w_mu=jax.random.normal(k[5], (LATENT_DIMS, H * W), jnp.float32) / jnp.sqrt(400.0),
        b_mu=0.1 * jax.random.normal(k[6], (LATENT_DIMS,), jnp.float32),
        w_sig=jax.random.normal(k[7], (LATENT_DIMS, H * W), jnp.float32) / jnp.sqrt(400.0),
        b_sig=0.1 * jax.random.normal(k[8], (LATENT_DIMS,), jnp.float32),
    )
    noise = jax.random.normal(k[9], (B, LATENT_DIMS), jnp.float32)  # stands in for N(0,1).sample

    packed = jax.tree_util.tree_map(jax.block_until_ready, pack_params(params))  # one-time prep

    z = jax.block_until_ready(encoder_forward(x, packed, noise))
    z_ref = _reference(x, params, noise)
    assert z.shape == (B, LATENT_DIMS)
    assert jnp.allclose(z, z_ref, atol=1e-4, rtol=1e-4), (z, z_ref)
    print("KERNEL_OK")
</pallas_src>

<mosaic_0001>
module attributes {stable_mosaic.version = 11 : i64} {
  func.func @_encoder_kernel(%arg0: memref<44xf32, #tpu.memory_space<smem>>, %arg1: memref<2x512xf32, #tpu.memory_space<vmem>>, %arg2: memref<8x512xf32, #tpu.memory_space<vmem>>, %arg3: memref<2x4xf32, #tpu.memory_space<vmem>>, %arg4: memref<2x4xf32, #tpu.memory_space<vmem>>) attributes {dimension_semantics = [], scalar_prefetch = 0 : i64, scratch_operands = 0 : i64, tpu.core_type = #tpu.core_type<tc>} {
    %c0 = arith.constant 0 : index
    %c0_0 = arith.constant 0 : index
    %0 = vector.load %arg1[%c0, %c0_0] : memref<2x512xf32, #tpu.memory_space<vmem>>, vector<2x512xf32>
    %1 = tpu.iota {dimensions = array<i32: 1>} : vector<1x512xi32>
    %c20_i32 = arith.constant 20 : i32
    %2 = vector.broadcast %c20_i32 : i32 to vector<1x512xi32>
    %3 = arith.remsi %1, %2 : vector<1x512xi32>
    %c400_i32 = arith.constant 400 : i32
    %4 = vector.broadcast %c400_i32 : i32 to vector<1x512xi32>
    %5 = arith.cmpi slt, %1, %4 : vector<1x512xi32>
    %6 = arith.extui %5 : vector<1x512xi1> to vector<1x512xi32>
    %7 = arith.sitofp %6 : vector<1x512xi32> to vector<1x512xf32>
    %c0_i32 = arith.constant 0 : i32
    %8 = vector.broadcast %c0_i32 : i32 to vector<1x512xi32>
    %9 = arith.cmpi ne, %3, %8 : vector<1x512xi32>
    %10 = arith.extui %9 : vector<1x512xi1> to vector<1x512xi32>
    %11 = arith.sitofp %10 : vector<1x512xi32> to vector<1x512xf32>
    %c19_i32 = arith.constant 19 : i32
    %12 = vector.broadcast %c19_i32 : i32 to vector<1x512xi32>
    %13 = arith.cmpi ne, %3, %12 : vector<1x512xi32>
    %14 = arith.extui %13 : vector<1x512xi1> to vector<1x512xi32>
    %15 = arith.sitofp %14 : vector<1x512xi32> to vector<1x512xf32>
    %c20_i32_1 = arith.constant 20 : i32
    %16 = vector.broadcast %c20_i32_1 : i32 to vector<1x512xi32>
    %17 = arith.cmpi sge, %1, %16 : vector<1x512xi32>
    %18 = arith.extui %17 : vector<1x512xi1> to vector<1x512xi32>
    %19 = arith.sitofp %18 : vector<1x512xi32> to vector<1x512xf32>
    %c380_i32 = arith.constant 380 : i32
    %20 = vector.broadcast %c380_i32 : i32 to vector<1x512xi32>
    %21 = arith.cmpi slt, %1, %20 : vector<1x512xi32>
    %22 = arith.extui %21 : vector<1x512xi1> to vector<1x512xi32>
    %23 = arith.sitofp %22 : vector<1x512xi32> to vector<1x512xf32>
    %c0_2 = arith.constant 0 : index
    %24 = memref.load %arg0[%c0_2] : memref<44xf32, #tpu.memory_space<smem>>
    %c1 = arith.constant 1 : index
    %25 = memref.load %arg0[%c1] : memref<44xf32, #tpu.memory_space<smem>>
    %c2 = arith.constant 2 : index
    %26 = memref.load %arg0[%c2] : memref<44xf32, #tpu.memory_space<smem>>
    %c3 = arith.constant 3 : index
    %27 = memref.load %arg0[%c3] : memref<44xf32, #tpu.memory_space<smem>>
    %c4 = arith.constant 4 : index
    %28 = memref.load %arg0[%c4] : memref<44xf32, #tpu.memory_space<smem>>
    %c5 = arith.constant 5 : index
    %29 = memref.load %arg0[%c5] : memref<44xf32, #tpu.memory_space<smem>>
    %c6 = arith.constant 6 : index
    %30 = memref.load %arg0[%c6] : memref<44xf32, #tpu.memory_space<smem>>
    %c7 = arith.constant 7 : index
    %31 = memref.load %arg0[%c7] : memref<44xf32, #tpu.memory_space<smem>>
    %c8 = arith.constant 8 : index
    %32 = memref.load %arg0[%c8] : memref<44xf32, #tpu.memory_space<smem>>
    %c9 = arith.constant 9 : index
    %33 = memref.load %arg0[%c9] : memref<44xf32, #tpu.memory_space<smem>>
    %c1_i32 = arith.constant 1 : i32
    %34 = tpu.dynamic_rotate %0 by %c1_i32 dim 1 : vector<2x512xf32>, i32 -> vector<2x512xf32>
    %35 = vector.broadcast %11 : vector<1x512xf32> to vector<2x512xf32>
    %36 = arith.mulf %34, %35 : vector<2x512xf32>
    %c511_i32 = arith.constant 511 : i32
    %37 = tpu.dynamic_rotate %0 by %c511_i32 dim 1 : vector<2x512xf32>, i32 -> vector<2x512xf32>
    %38 = vector.broadcast %15 : vector<1x512xf32> to vector<2x512xf32>
    %39 = arith.mulf %37, %38 : vector<2x512xf32>
    %40 = vector.broadcast %24 : f32 to vector<2x512xf32>
    %41 = arith.mulf %40, %36 : vector<2x512xf32>
    %42 = vector.broadcast %25 : f32 to vector<2x512xf32>
    %43 = arith.mulf %42, %0 : vector<2x512xf32>
    %44 = arith.addf %41, %43 : vector<2x512xf32>
    %45 = vector.broadcast %26 : f32 to vector<2x512xf32>
    %46 = arith.mulf %45, %39 : vector<2x512xf32>
    %47 = arith.addf %44, %46 : vector<2x512xf32>
    %48 = vector.broadcast %27 : f32 to vector<2x512xf32>
    %49 = arith.mulf %48, %36 : vector<2x512xf32>
    %50 = vector.broadcast %28 : f32 to vector<2x512xf32>
    %51 = arith.mulf %50, %0 : vector<2x512xf32>
    %52 = arith.addf %49, %51 : vector<2x512xf32>
    %53 = vector.broadcast %29 : f32 to vector<2x512xf32>
    %54 = arith.mulf %53, %39 : vector<2x512xf32>
    %55 = arith.addf %52, %54 : vector<2x512xf32>
    %56 = vector.broadcast %30 : f32 to vector<2x512xf32>
    %57 = arith.mulf %56, %36 : vector<2x512xf32>
    %58 = vector.broadcast %31 : f32 to vector<2x512xf32>
    %59 = arith.mulf %58, %0 : vector<2x512xf32>
    %60 = arith.addf %57, %59 : vector<2x512xf32>
    %61 = vector.broadcast %32 : f32 to vector<2x512xf32>
    %62 = arith.mulf %61, %39 : vector<2x512xf32>
    %63 = arith.addf %60, %62 : vector<2x512xf32>
    %64 = vector.broadcast %33 : f32 to vector<2x512xf32>
    %65 = arith.addf %55, %64 : vector<2x512xf32>
    %c20_i32_3 = arith.constant 20 : i32
    %66 = tpu.dynamic_rotate %47 by %c20_i32_3 dim 1 : vector<2x512xf32>, i32 -> vector<2x512xf32>
    %67 = vector.broadcast %19 : vector<1x512xf32> to vector<2x512xf32>
    %68 = arith.mulf %66, %67 : vector<2x512xf32>
    %69 = arith.addf %65, %68 : vector<2x512xf32>
    %c492_i32 = arith.constant 492 : i32
    %70 = tpu.dynamic_rotate %63 by %c492_i32 dim 1 : vector<2x512xf32>, i32 -> vector<2x512xf32>
    %71 = vector.broadcast %23 : vector<1x512xf32> to vector<2x512xf32>
    %72 = arith.mulf %70, %71 : vector<2x512xf32>
    %73 = arith.addf %69, %72 : vector<2x512xf32>
    %74 = vector.broadcast %7 : vector<1x512xf32> to vector<2x512xf32>
    %75 = arith.mulf %73, %74 : vector<2x512xf32>
    %c10 = arith.constant 10 : index
    %76 = memref.load %arg0[%c10] : memref<44xf32, #tpu.memory_space<smem>>
    %c11 = arith.constant 11 : index
    %77 = memref.load %arg0[%c11] : memref<44xf32, #tpu.memory_space<smem>>
    %78 = vector.shape_cast %75 : vector<2x512xf32> to vector<1x2x512xf32>
    %cst = arith.constant dense<0.000000e+00> : vector<1xf32>
    %79 = vector.multi_reduction <add>, %78, %cst [1, 2] : vector<1x2x512xf32> to vector<1xf32>
    %80 = vector.shape_cast %79 : vector<1xf32> to vector<1x1x1xf32>
    %81 = vector.extract %80[0, 0, 0] : f32 from vector<1x1x1xf32>
    %82 = arith.mulf %75, %75 : vector<2x512xf32>
    %83 = vector.shape_cast %82 : vector<2x512xf32> to vector<1x2x512xf32>
    %cst_4 = arith.constant dense<0.000000e+00> : vector<1xf32>
    %84 = vector.multi_reduction <add>, %83, %cst_4 [1, 2] : vector<1x2x512xf32> to vector<1xf32>
    %85 = vector.shape_cast %84 : vector<1xf32> to vector<1x1x1xf32>
    %86 = vector.extract %85[0, 0, 0] : f32 from vector<1x1x1xf32>
    %cst_5 = arith.constant 1.250000e-03 : f32
    %87 = arith.mulf %81, %cst_5 : f32
    %cst_6 = arith.constant 1.250000e-03 : f32
    %88 = arith.mulf %86, %cst_6 : f32
    %89 = arith.mulf %87, %87 : f32
    %90 = arith.subf %88, %89 : f32
    %cst_7 = arith.constant 9.99999974E-6 : f32
    %91 = arith.addf %90, %cst_7 : f32
    %92 = math.rsqrt %91 : f32
    %93 = arith.mulf %92, %76 : f32
    %94 = arith.mulf %87, %93 : f32
    %95 = arith.subf %77, %94 : f32
    %96 = vector.broadcast %93 : f32 to vector<2x512xf32>
    %97 = arith.mulf %75, %96 : vector<2x512xf32>
    %98 = vector.broadcast %95 : f32 to vector<2x512xf32>
    %99 = arith.addf %97, %98 : vector<2x512xf32>
    %cst_8 = arith.constant 0.000000e+00 : f32
    %100 = vector.broadcast %cst_8 : f32 to vector<2x512xf32>
    %101 = arith.maximumf %99, %100 : vector<2x512xf32>
    %102 = vector.broadcast %7 : vector<1x512xf32> to vector<2x512xf32>
    %103 = arith.mulf %101, %102 : vector<2x512xf32>
    %c12 = arith.constant 12 : index
    %104 = memref.load %arg0[%c12] : memref<44xf32, #tpu.memory_space<smem>>
    %c13 = arith.constant 13 : index
    %105 = memref.load %arg0[%c13] : memref<44xf32, #tpu.memory_space<smem>>
    %c14 = arith.constant 14 : index
    %106 = memref.load %arg0[%c14] : memref<44xf32, #tpu.memory_space<smem>>
    %c15 = arith.constant 15 : index
    %107 = memref.load %arg0[%c15] : memref<44xf32, #tpu.memory_space<smem>>
    %c16 = arith.constant 16 : index
    %108 = memref.load %arg0[%c16] : memref<44xf32, #tpu.memory_space<smem>>
    %c17 = arith.constant 17 : index
    %109 = memref.load %arg0[%c17] : memref<44xf32, #tpu.memory_space<smem>>
    %c18 = arith.constant 18 : index
    %110 = memref.load %arg0[%c18] : memref<44xf32, #tpu.memory_space<smem>>
    %c19 = arith.constant 19 : index
    %111 = memref.load %arg0[%c19] : memref<44xf32, #tpu.memory_space<smem>>
    %c20 = arith.constant 20 : index
    %112 = memref.load %arg0[%c20] : memref<44xf32, #tpu.memory_space<smem>>
    %c21 = arith.constant 21 : index
    %113 = memref.load %arg0[%c21] : memref<44xf32, #tpu.memory_space<smem>>
    %c1_i32_9 = arith.constant 1 : i32
    %114 = tpu.dynamic_rotate %103 by %c1_i32_9 dim 1 : vector<2x512xf32>, i32 -> vector<2x512xf32>
    %115 = vector.broadcast %11 : vector<1x512xf32> to vector<2x512xf32>
    %116 = arith.mulf %114, %115 : vector<2x512xf32>
    %c511_i32_10 = arith.constant 511 : i32
    %117 = tpu.dynamic_rotate %103 by %c511_i32_10 dim 1 : vector<2x512xf32>, i32 -> vector<2x512xf32>
    %118 = vector.broadcast %15 : vector<1x512xf32> to vector<2x512xf32>
    %119 = arith.mulf %117, %118 : vector<2x512xf32>
    %120 = vector.broadcast %104 : f32 to vector<2x512xf32>
    %121 = arith.mulf %120, %116 : vector<2x512xf32>
    %122 = vector.broadcast %105 : f32 to vector<2x512xf32>
    %123 = arith.mulf %122, %103 : vector<2x512xf32>
    %124 = arith.addf %121, %123 : vector<2x512xf32>
    %125 = vector.broadcast %106 : f32 to vector<2x512xf32>
    %126 = arith.mulf %125, %119 : vector<2x512xf32>
    %127 = arith.addf %124, %126 : vector<2x512xf32>
    %128 = vector.broadcast %107 : f32 to vector<2x512xf32>
    %129 = arith.mulf %128, %116 : vector<2x512xf32>
    %130 = vector.broadcast %108 : f32 to vector<2x512xf32>
    %131 = arith.mulf %130, %103 : vector<2x512xf32>
    %132 = arith.addf %129, %131 : vector<2x512xf32>
    %133 = vector.broadcast %109 : f32 to vector<2x512xf32>
    %134 = arith.mulf %133, %119 : vector<2x512xf32>
    %135 = arith.addf %132, %134 : vector<2x512xf32>
    %136 = vector.broadcast %110 : f32 to vector<2x512xf32>
    %137 = arith.mulf %136, %116 : vector<2x512xf32>
    %138 = vector.broadcast %111 : f32 to vector<2x512xf32>
    %139 = arith.mulf %138, %103 : vector<2x512xf32>
    %140 = arith.addf %137, %139 : vector<2x512xf32>
    %141 = vector.broadcast %112 : f32 to vector<2x512xf32>
    %142 = arith.mulf %141, %119 : vector<2x512xf32>
    %143 = arith.addf %140, %142 : vector<2x512xf32>
    %144 = vector.broadcast %113 : f32 to vector<2x512xf32>
    %145 = arith.addf %135, %144 : vector<2x512xf32>
    %c20_i32_11 = arith.constant 20 : i32
    %146 = tpu.dynamic_rotate %127 by %c20_i32_11 dim 1 : vector<2x512xf32>, i32 -> vector<2x512xf32>
    %147 = vector.broadcast %19 : vector<1x512xf32> to vector<2x512xf32>
    %148 = arith.mulf %146, %147 : vector<2x512xf32>
    %149 = arith.addf %145, %148 : vector<2x512xf32>
    %c492_i32_12 = arith.constant 492 : i32
    %150 = tpu.dynamic_rotate %143 by %c492_i32_12 dim 1 : vector<2x512xf32>, i32 -> vector<2x512xf32>
    %151 = vector.broadcast %23 : vector<1x512xf32> to vector<2x512xf32>
    %152 = arith.mulf %150, %151 : vector<2x512xf32>
    %153 = arith.addf %149, %152 : vector<2x512xf32>
    %154 = vector.broadcast %7 : vector<1x512xf32> to vector<2x512xf32>
    %155 = arith.mulf %153, %154 : vector<2x512xf32>
    %c22 = arith.constant 22 : index
    %156 = memref.load %arg0[%c22] : memref<44xf32, #tpu.memory_space<smem>>
    %c23 = arith.constant 23 : index
    %157 = memref.load %arg0[%c23] : memref<44xf32, #tpu.memory_space<smem>>
    %158 = vector.shape_cast %155 : vector<2x512xf32> to vector<1x2x512xf32>
    %cst_13 = arith.constant dense<0.000000e+00> : vector<1xf32>
    %159 = vector.multi_reduction <add>, %158, %cst_13 [1, 2] : vector<1x2x512xf32> to vector<1xf32>
    %160 = vector.shape_cast %159 : vector<1xf32> to vector<1x1x1xf32>
    %161 = vector.extract %160[0, 0, 0] : f32 from vector<1x1x1xf32>
    %162 = arith.mulf %155, %155 : vector<2x512xf32>
    %163 = vector.shape_cast %162 : vector<2x512xf32> to vector<1x2x512xf32>
    %cst_14 = arith.constant dense<0.000000e+00> : vector<1xf32>
    %164 = vector.multi_reduction <add>, %163, %cst_14 [1, 2] : vector<1x2x512xf32> to vector<1xf32>
    %165 = vector.shape_cast %164 : vector<1xf32> to vector<1x1x1xf32>
    %166 = vector.extract %165[0, 0, 0] : f32 from vector<1x1x1xf32>
    %cst_15 = arith.constant 1.250000e-03 : f32
    %167 = arith.mulf %161, %cst_15 : f32
    %cst_16 = arith.constant 1.250000e-03 : f32
    %168 = arith.mulf %166, %cst_16 : f32
    %169 = arith.mulf %167, %167 : f32
    %170 = arith.subf %168, %169 : f32
    %cst_17 = arith.constant 9.99999974E-6 : f32
    %171 = arith.addf %170, %cst_17 : f32
    %172 = math.rsqrt %171 : f32
    %173 = arith.mulf %172, %156 : f32
    %174 = arith.mulf %167, %173 : f32
    %175 = arith.subf %157, %174 : f32
    %176 = vector.broadcast %173 : f32 to vector<2x512xf32>
    %177 = arith.mulf %155, %176 : vector<2x512xf32>
    %178 = vector.broadcast %175 : f32 to vector<2x512xf32>
    %179 = arith.addf %177, %178 : vector<2x512xf32>
    %cst_18 = arith.constant 0.000000e+00 : f32
    %180 = vector.broadcast %cst_18 : f32 to vector<2x512xf32>
    %181 = arith.maximumf %179, %180 : vector<2x512xf32>
    %182 = vector.broadcast %7 : vector<1x512xf32> to vector<2x512xf32>
    %183 = arith.mulf %181, %182 : vector<2x512xf32>
    %184 = arith.addf %183, %0 : vector<2x512xf32>
    %c24 = arith.constant 24 : index
    %185 = memref.load %arg0[%c24] : memref<44xf32, #tpu.memory_space<smem>>
    %c25 = arith.constant 25 : index
    %186 = memref.load %arg0[%c25] : memref<44xf32, #tpu.memory_space<smem>>
    %c26 = arith.constant 26 : index
    %187 = memref.load %arg0[%c26] : memref<44xf32, #tpu.memory_space<smem>>
    %c27 = arith.constant 27 : index
    %188 = memref.load %arg0[%c27] : memref<44xf32, #tpu.memory_space<smem>>
    %c28 = arith.constant 28 : index
    %189 = memref.load %arg0[%c28] : memref<44xf32, #tpu.memory_space<smem>>
    %c29 = arith.constant 29 : index
    %190 = memref.load %arg0[%c29] : memref<44xf32, #tpu.memory_space<smem>>
    %c30 = arith.constant 30 : index
    %191 = memref.load %arg0[%c30] : memref<44xf32, #tpu.memory_space<smem>>
    %c31 = arith.constant 31 : index
    %192 = memref.load %arg0[%c31] : memref<44xf32, #tpu.memory_space<smem>>
    %c32 = arith.constant 32 : index
    %193 = memref.load %arg0[%c32] : memref<44xf32, #tpu.memory_space<smem>>
    %c33 = arith.constant 33 : index
    %194 = memref.load %arg0[%c33] : memref<44xf32, #tpu.memory_space<smem>>
    %c1_i32_19 = arith.constant 1 : i32
    %195 = tpu.dynamic_rotate %184 by %c1_i32_19 dim 1 : vector<2x512xf32>, i32 -> vector<2x512xf32>
    %196 = vector.broadcast %11 : vector<1x512xf32> to vector<2x512xf32>
    %197 = arith.mulf %195, %196 : vector<2x512xf32>
    %c511_i32_20 = arith.constant 511 : i32
    %198 = tpu.dynamic_rotate %184 by %c511_i32_20 dim 1 : vector<2x512xf32>, i32 -> vector<2x512xf32>
    %199 = vector.broadcast %15 : vector<1x512xf32> to vector<2x512xf32>
    %200 = arith.mulf %198, %199 : vector<2x512xf32>
    %201 = vector.broadcast %185 : f32 to vector<2x512xf32>
    %202 = arith.mulf %201, %197 : vector<2x512xf32>
    %203 = vector.broadcast %186 : f32 to vector<2x512xf32>
    %204 = arith.mulf %203, %184 : vector<2x512xf32>
    %205 = arith.addf %202, %204 : vector<2x512xf32>
    %206 = vector.broadcast %187 : f32 to vector<2x512xf32>
    %207 = arith.mulf %206, %200 : vector<2x512xf32>
    %208 = arith.addf %205, %207 : vector<2x512xf32>
    %209 = vector.broadcast %188 : f32 to vector<2x512xf32>
    %210 = arith.mulf %209, %197 : vector<2x512xf32>
    %211 = vector.broadcast %189 : f32 to vector<2x512xf32>
    %212 = arith.mulf %211, %184 : vector<2x512xf32>
    %213 = arith.addf %210, %212 : vector<2x512xf32>
    %214 = vector.broadcast %190 : f32 to vector<2x512xf32>
    %215 = arith.mulf %214, %200 : vector<2x512xf32>
    %216 = arith.addf %213, %215 : vector<2x512xf32>
    %217 = vector.broadcast %191 : f32 to vector<2x512xf32>
    %218 = arith.mulf %217, %197 : vector<2x512xf32>
    %219 = vector.broadcast %192 : f32 to vector<2x512xf32>
    %220 = arith.mulf %219, %184 : vector<2x512xf32>
    %221 = arith.addf %218, %220 : vector<2x512xf32>
    %222 = vector.broadcast %193 : f32 to vector<2x512xf32>
    %223 = arith.mulf %222, %200 : vector<2x512xf32>
    %224 = arith.addf %221, %223 : vector<2x512xf32>
    %225 = vector.broadcast %194 : f32 to vector<2x512xf32>
    %226 = arith.addf %216, %225 : vector<2x512xf32>
    %c20_i32_21 = arith.constant 20 : i32
    %227 = tpu.dynamic_rotate %208 by %c20_i32_21 dim 1 : vector<2x512xf32>, i32 -> vector<2x512xf32>
    %228 = vector.broadcast %19 : vector<1x512xf32> to vector<2x512xf32>
    %229 = arith.mulf %227, %228 : vector<2x512xf32>
    %230 = arith.addf %226, %229 : vector<2x512xf32>
    %c492_i32_22 = arith.constant 492 : i32
    %231 = tpu.dynamic_rotate %224 by %c492_i32_22 dim 1 : vector<2x512xf32>, i32 -> vector<2x512xf32>
    %232 = vector.broadcast %23 : vector<1x512xf32> to vector<2x512xf32>
    %233 = arith.mulf %231, %232 : vector<2x512xf32>
    %234 = arith.addf %230, %233 : vector<2x512xf32>
    %235 = vector.broadcast %7 : vector<1x512xf32> to vector<2x512xf32>
    %236 = arith.mulf %234, %235 : vector<2x512xf32>
    %c34 = arith.constant 34 : index
    %237 = memref.load %arg0[%c34] : memref<44xf32, #tpu.memory_space<smem>>
    %c35 = arith.constant 35 : index
    %238 = memref.load %arg0[%c35] : memref<44xf32, #tpu.memory_space<smem>>
    %239 = vector.shape_cast %236 : vector<2x512xf32> to vector<1x2x512xf32>
    %cst_23 = arith.constant dense<0.000000e+00> : vector<1xf32>
    %240 = vector.multi_reduction <add>, %239, %cst_23 [1, 2] : vector<1x2x512xf32> to vector<1xf32>
    %241 = vector.shape_cast %240 : vector<1xf32> to vector<1x1x1xf32>
    %242 = vector.extract %241[0, 0, 0] : f32 from vector<1x1x1xf32>
    %243 = arith.mulf %236, %236 : vector<2x512xf32>
    %244 = vector.shape_cast %243 : vector<2x512xf32> to vector<1x2x512xf32>
    %cst_24 = arith.constant dense<0.000000e+00> : vector<1xf32>
    %245 = vector.multi_reduction <add>, %244, %cst_24 [1, 2] : vector<1x2x512xf32> to vector<1xf32>
    %246 = vector.shape_cast %245 : vector<1xf32> to vector<1x1x1xf32>
    %247 = vector.extract %246[0, 0, 0] : f32 from vector<1x1x1xf32>
    %cst_25 = arith.constant 1.250000e-03 : f32
    %248 = arith.mulf %242, %cst_25 : f32
    %cst_26 = arith.constant 1.250000e-03 : f32
    %249 = arith.mulf %247, %cst_26 : f32
    %250 = arith.mulf %248, %248 : f32
    %251 = arith.subf %249, %250 : f32
    %cst_27 = arith.constant 9.99999974E-6 : f32
    %252 = arith.addf %251, %cst_27 : f32
    %253 = math.rsqrt %252 : f32
    %254 = arith.mulf %253, %237 : f32
    %255 = arith.mulf %248, %254 : f32
    %256 = arith.subf %238, %255 : f32
    %257 = vector.broadcast %254 : f32 to vector<2x512xf32>
    %258 = arith.mulf %236, %257 : vector<2x512xf32>
    %259 = vector.broadcast %256 : f32 to vector<2x512xf32>
    %260 = arith.addf %258, %259 : vector<2x512xf32>
    %cst_28 = arith.constant 0.000000e+00 : f32
    %261 = vector.broadcast %cst_28 : f32 to vector<2x512xf32>
    %262 = arith.maximumf %260, %261 : vector<2x512xf32>
    %263 = vector.broadcast %7 : vector<1x512xf32> to vector<2x512xf32>
    %264 = arith.mulf %262, %263 : vector<2x512xf32>
    %c0_29 = arith.constant 0 : index
    %c0_30 = arith.constant 0 : index
    %265 = vector.load %arg3[%c0_29, %c0_30] : memref<2x4xf32, #tpu.memory_space<vmem>>, vector<2x4xf32>
    %c0_31 = arith.constant 0 : index
    %c0_32 = arith.constant 0 : index
    %266 = vector.load %arg2[%c0_31, %c0_32] : memref<8x512xf32, #tpu.memory_space<vmem>>, vector<1x512xf32>
    %c4_33 = arith.constant 4 : index
    %c0_34 = arith.constant 0 : index
    %267 = vector.load %arg2[%c4_33, %c0_34] : memref<8x512xf32, #tpu.memory_space<vmem>>, vector<1x512xf32>
    %268 = vector.broadcast %266 : vector<1x512xf32> to vector<2x512xf32>
    %269 = arith.mulf %264, %268 : vector<2x512xf32>
    %cst_35 = arith.constant dense<0.000000e+00> : vector<2xf32>
    %270 = vector.multi_reduction <add>, %269, %cst_35 [1] : vector<2x512xf32> to vector<2xf32>
    %271 = vector.shape_cast %270 : vector<2xf32> to vector<2x1xf32>
    %c36 = arith.constant 36 : index
    %272 = memref.load %arg0[%c36] : memref<44xf32, #tpu.memory_space<smem>>
    %273 = vector.broadcast %272 : f32 to vector<2x1xf32>
    %274 = arith.addf %271, %273 : vector<2x1xf32>
    %275 = vector.broadcast %267 : vector<1x512xf32> to vector<2x512xf32>
    %276 = arith.mulf %264, %275 : vector<2x512xf32>
    %cst_36 = arith.constant dense<0.000000e+00> : vector<2xf32>
    %277 = vector.multi_reduction <add>, %276, %cst_36 [1] : vector<2x512xf32> to vector<2xf32>
    %278 = vector.shape_cast %277 : vector<2xf32> to vector<2x1xf32>
    %c40 = arith.constant 40 : index
    %279 = memref.load %arg0[%c40] : memref<44xf32, #tpu.memory_space<smem>>
    %280 = vector.broadcast %279 : f32 to vector<2x1xf32>
    %281 = arith.addf %278, %280 : vector<2x1xf32>
    %282 = math.exp %281 : vector<2x1xf32>
    %283 = vector.extract_strided_slice %265 {offsets = [0, 0], sizes = [2, 1], strides = [1, 1]} : vector<2x4xf32> to vector<2x1xf32>
    %284 = arith.mulf %282, %283 : vector<2x1xf32>
    %285 = arith.addf %274, %284 : vector<2x1xf32>
    %c1_37 = arith.constant 1 : index
    %c0_38 = arith.constant 0 : index
    %286 = vector.load %arg2[%c1_37, %c0_38] : memref<8x512xf32, #tpu.memory_space<vmem>>, vector<1x512xf32>
    %c5_39 = arith.constant 5 : index
    %c0_40 = arith.constant 0 : index
    %287 = vector.load %arg2[%c5_39, %c0_40] : memref<8x512xf32, #tpu.memory_space<vmem>>, vector<1x512xf32>
    %288 = vector.broadcast %286 : vector<1x512xf32> to vector<2x512xf32>
    %289 = arith.mulf %264, %288 : vector<2x512xf32>
    %cst_41 = arith.constant dense<0.000000e+00> : vector<2xf32>
    %290 = vector.multi_reduction <add>, %289, %cst_41 [1] : vector<2x512xf32> to vector<2xf32>
    %291 = vector.shape_cast %290 : vector<2xf32> to vector<2x1xf32>
    %c37 = arith.constant 37 : index
    %292 = memref.load %arg0[%c37] : memref<44xf32, #tpu.memory_space<smem>>
    %293 = vector.broadcast %292 : f32 to vector<2x1xf32>
    %294 = arith.addf %291, %293 : vector<2x1xf32>
    %295 = vector.broadcast %287 : vector<1x512xf32> to vector<2x512xf32>
    %296 = arith.mulf %264, %295 : vector<2x512xf32>
    %cst_42 = arith.constant dense<0.000000e+00> : vector<2xf32>
    %297 = vector.multi_reduction <add>, %296, %cst_42 [1] : vector<2x512xf32> to vector<2xf32>
    %298 = vector.shape_cast %297 : vector<2xf32> to vector<2x1xf32>
    %c41 = arith.constant 41 : index
    %299 = memref.load %arg0[%c41] : memref<44xf32, #tpu.memory_space<smem>>
    %300 = vector.broadcast %299 : f32 to vector<2x1xf32>
    %301 = arith.addf %298, %300 : vector<2x1xf32>
    %302 = math.exp %301 : vector<2x1xf32>
    %303 = vector.extract_strided_slice %265 {offsets = [0, 1], sizes = [2, 1], strides = [1, 1]} : vector<2x4xf32> to vector<2x1xf32>
    %304 = arith.mulf %302, %303 : vector<2x1xf32>
    %305 = arith.addf %294, %304 : vector<2x1xf32>
    %c2_43 = arith.constant 2 : index
    %c0_44 = arith.constant 0 : index
    %306 = vector.load %arg2[%c2_43, %c0_44] : memref<8x512xf32, #tpu.memory_space<vmem>>, vector<1x512xf32>
    %c6_45 = arith.constant 6 : index
    %c0_46 = arith.constant 0 : index
    %307 = vector.load %arg2[%c6_45, %c0_46] : memref<8x512xf32, #tpu.memory_space<vmem>>, vector<1x512xf32>
    %308 = vector.broadcast %306 : vector<1x512xf32> to vector<2x512xf32>
    %309 = arith.mulf %264, %308 : vector<2x512xf32>
    %cst_47 = arith.constant dense<0.000000e+00> : vector<2xf32>
    %310 = vector.multi_reduction <add>, %309, %cst_47 [1] : vector<2x512xf32> to vector<2xf32>
    %311 = vector.shape_cast %310 : vector<2xf32> to vector<2x1xf32>
    %c38 = arith.constant 38 : index
    %312 = memref.load %arg0[%c38] : memref<44xf32, #tpu.memory_space<smem>>
    %313 = vector.broadcast %312 : f32 to vector<2x1xf32>
    %314 = arith.addf %311, %313 : vector<2x1xf32>
    %315 = vector.broadcast %307 : vector<1x512xf32> to vector<2x512xf32>
    %316 = arith.mulf %264, %315 : vector<2x512xf32>
    %cst_48 = arith.constant dense<0.000000e+00> : vector<2xf32>
    %317 = vector.multi_reduction <add>, %316, %cst_48 [1] : vector<2x512xf32> to vector<2xf32>
    %318 = vector.shape_cast %317 : vector<2xf32> to vector<2x1xf32>
    %c42 = arith.constant 42 : index
    %319 = memref.load %arg0[%c42] : memref<44xf32, #tpu.memory_space<smem>>
    %320 = vector.broadcast %319 : f32 to vector<2x1xf32>
    %321 = arith.addf %318, %320 : vector<2x1xf32>
    %322 = math.exp %321 : vector<2x1xf32>
    %323 = vector.extract_strided_slice %265 {offsets = [0, 2], sizes = [2, 1], strides = [1, 1]} : vector<2x4xf32> to vector<2x1xf32>
    %324 = arith.mulf %322, %323 : vector<2x1xf32>
    %325 = arith.addf %314, %324 : vector<2x1xf32>
    %c3_49 = arith.constant 3 : index
    %c0_50 = arith.constant 0 : index
    %326 = vector.load %arg2[%c3_49, %c0_50] : memref<8x512xf32, #tpu.memory_space<vmem>>, vector<1x512xf32>
    %c7_51 = arith.constant 7 : index
    %c0_52 = arith.constant 0 : index
    %327 = vector.load %arg2[%c7_51, %c0_52] : memref<8x512xf32, #tpu.memory_space<vmem>>, vector<1x512xf32>
    %328 = vector.broadcast %326 : vector<1x512xf32> to vector<2x512xf32>
    %329 = arith.mulf %264, %328 : vector<2x512xf32>
    %cst_53 = arith.constant dense<0.000000e+00> : vector<2xf32>
    %330 = vector.multi_reduction <add>, %329, %cst_53 [1] : vector<2x512xf32> to vector<2xf32>
    %331 = vector.shape_cast %330 : vector<2xf32> to vector<2x1xf32>
    %c39 = arith.constant 39 : index
    %332 = memref.load %arg0[%c39] : memref<44xf32, #tpu.memory_space<smem>>
    %333 = vector.broadcast %332 : f32 to vector<2x1xf32>
    %334 = arith.addf %331, %333 : vector<2x1xf32>
    %335 = vector.broadcast %327 : vector<1x512xf32> to vector<2x512xf32>
    %336 = arith.mulf %264, %335 : vector<2x512xf32>
    %cst_54 = arith.constant dense<0.000000e+00> : vector<2xf32>
    %337 = vector.multi_reduction <add>, %336, %cst_54 [1] : vector<2x512xf32> to vector<2xf32>
    %338 = vector.shape_cast %337 : vector<2xf32> to vector<2x1xf32>
    %c43 = arith.constant 43 : index
    %339 = memref.load %arg0[%c43] : memref<44xf32, #tpu.memory_space<smem>>
    %340 = vector.broadcast %339 : f32 to vector<2x1xf32>
    %341 = arith.addf %338, %340 : vector<2x1xf32>
    %342 = math.exp %341 : vector<2x1xf32>
    %343 = vector.extract_strided_slice %265 {offsets = [0, 3], sizes = [2, 1], strides = [1, 1]} : vector<2x4xf32> to vector<2x1xf32>
    %344 = arith.mulf %342, %343 : vector<2x1xf32>
    %345 = arith.addf %334, %344 : vector<2x1xf32>
    %346 = tpu.concatenate %285, %305, %325, %345 in 1 : vector<2x1xf32>, vector<2x1xf32>, vector<2x1xf32>, vector<2x1xf32> -> vector<2x4xf32>
    %c0_55 = arith.constant 0 : index
    %c0_56 = arith.constant 0 : index
    %347 = vector.load %arg4[%c0_55, %c0_56] : memref<2x4xf32, #tpu.memory_space<vmem>>, vector<2x4xf32>
    tpu.vector_store %arg4[%c0_55, %c0_56], %346 {strides = array<i32>} : memref<2x4xf32, #tpu.memory_space<vmem>>, vector<2x4xf32>,
    return
  }
}

</mosaic_0001>

<bundles_post_ra>
// kernel: encoder_forward.1
= control target key start
LH: loop header
LB: loop body
LE: loop exit
PB: predicated region body
PF: predicated region fallthrough
CT: control target
= control target key end

     0   :  { %9 = vsyncpa [#allocation4], 0  ;;  %s2202_s0 = inlined_call_operand.vmem [shape: f32[44], index: 0, kind: input, shape index: {}]   ;;  %s2203_s1 = inlined_call_operand.vmem [shape: f32[2,512], index: 1, kind: input, shape index: {}]   ;;  %s2204_s2 = inlined_call_operand.vmem [shape: f32[8,512], index: 2, kind: input, shape index: {}]   ;;  %s2205_s3 = inlined_call_operand.vmem [shape: f32[2,4], index: 3, kind: input, shape index: {}]   ;;  %s2206_s4 = inlined_call_operand.hbm [shape: f32[2,4], index: 4, kind: output, shape index: {}]  }
   0x1   :  { %10 = vsyncpa [#allocation3], 0  ;;  %s17_s17 = sshll.u32 %s2202_s0, 4  ;;  %s18_s17 = int_to_ptr.vmem [resolvable:$true] %s17_s17 }
   0x2   :  { %s1371_s18 = scalar_lea.vmem %s18_s17, 16  ;;  %p1376_p1 = scmp.lt.s32.totalorder %s18_s17, %s18_s17 }
   0x3   :  { %p1372_p0 = scmp.ne.s32.totalorder %s18_s17, %s1371_s18  ;;  %p1377_p2 = scmp.lt.s32.totalorder %s1371_s18, %s1371_s18 }
   0x5   :  { %p1378_p3 = por %p1377_p2, %p1376_p1 }
   0x7   :  { %p1379_p4 = pnand %p1378_p3, %p1372_p0 }
   0x9   :  { %1382 = shalt.err (!%p1379_p4)
}
   0xa   :  { %s1407_s19 = smov [#allocation2]  }
   0xb   :  { %20 = dma.vmem_to_smem %s18_s17, 16, %s1407_s19, [#allocation4]  }
   0xc   :  { %1403 = dma.done.wait [#allocation4], 16  }
   0xd   :  { %1404 = vsyncadd [#allocation4], 4294967280 }
   0xe   :  { %30 = sfence }
   0xf   :  { %v31_v0 = vld [vmem:[%s2203_s1] sm:$0xff]  ;;  %v32_v1 = vlaneseq  ;;  %v1408_v2 = vmov 1983009808   ;;  %s1275_s0 = sld [smem:[#allocation2 + $0x4]]  ;;  %s1409_s24 = smov 1   ;;  %v1411_v52 = vmov 0.0  }
  0x10   :  { %v154_v3 = vunpack.c.l.s4 %v1408_v2  ;;  %v152_v6 = vcombine.high %v31_v0, %v31_v0  ;;  %s1272_s22 = sld [smem:[#allocation2 + $0x1]]  ;;  %s1410_s1 = smov 127   ;;  %vm386_vm15 = vcmask 1041408  }
  0x11   :  { %v1446_v4 = vshrl.u32 %v32_v1, 7  ;;  %s1278_s23 = sld [smem:[#allocation2 + $0x7]]  ;;  %v1489_v27 = vand.u32 127, %v32_v1  ;;  %s1412_s5 = smov 20  }
  0x12   :  { %v155_v5 = vunpack.c.0.s8 %v154_v3  ;;  %s1274_s25 = sld [smem:[#allocation2 + $0x3]]  ;;  %s1413_s6 = smov 108  }
  0x13   :  { %2209 = vst [vmem:[#allocation8_spill] sm:$0xff] %v1446_v4  ;;  %v1492_v28 = vadd.s32 384, %v1489_v27  ;;  %v1495_v29 = vmul.u32.u64.low 3435973837, %v1489_v27  ;;  %v1496_v30 = vmul.u32.u64.high 3435973837, %v1489_v27, %v1495_v29  ;;  %v34_v31 = vadd.s32 128, %v1489_v27  ;;  %s141_s26 = sld [smem:[#allocation2]] }
  0x14   :  { %v158_v7 = vsub.s32 %v155_v5, %v1446_v4  ;;  %v1500_v32 = vadd.s32 256, %v1489_v27  ;;  %s1277_s27 = sld [smem:[#allocation2 + $0x6]]  ;;  %vm181_vm1 = vcmp.lt.s32.totalorder %v1489_v27, 1  ;;  %vm198_vm6 = vcmp.lt.s32.totalorder %v1489_v27, 127 }
  0x15   :  { %v254_v11 = vstv %s1275_s0  ;;  %v1503_v33 = vmul.u32.u64.low 3435973837, %v1492_v28  ;;  %v1504_v34 = vmul.u32.u64.high 3435973837, %v1492_v28, %v1503_v33  ;;  %v43_v39 = vshrl.u32 %v1496_v30, 4  ;;  %s1276_s28 = sld [smem:[#allocation2 + $0x5]] }
  0x16   :  { %v1449_v8 = vrot.slane %v31_v0, %v158_v7  ;;  %v1451_v9 = vrot.slane %v152_v6, %v158_v7  ;;  %v255_v12 = vmul.f32 %v254_v11, %v31_v0  ;;  %v212_v15 = vstv %s1272_s22  ;;  %s1529_s29 = sld [smem:[#allocation2 + $0x2]] }
  0x17   :  { %v213_v16 = vmul.f32 %v212_v15, %v31_v0  ;;  %v296_v17 = vstv %s1278_s23  ;;  %v1506_v35 = vmul.u32.u64.low 3435973837, %v34_v31  ;;  %v1507_v36 = vmul.u32.u64.high 3435973837, %v34_v31, %v1506_v35  ;;  %s1534_s30 = sld [smem:[#allocation2 + $0x8]] }
  0x18   :  { %173 = vrot.lane.b32.xlu0 %v1449_v8, %s1409_s24  ;;  %v1457_v10 = vcombine.high %v1451_v9, %v1451_v9  ;;  %v1463_v13 = vcombine.high %v1449_v8, %v1449_v8  ;;  %v1465_v14 = vrot.slane %v255_v12, %v158_v7  ;;  %v297_v20 = vmul.f32 %v296_v17, %v31_v0  ;;  %s1280_s7 = sld [smem:[#allocation2 + $0x9]] }
  0x19   :  { %v1473_v18 = vrot.slane %v213_v16, %v158_v7  ;;  %v215_v19 = vcombine.high %v213_v16, %v213_v16  ;;  %v257_v21 = vcombine.high %v255_v12, %v255_v12  ;;  %v76_v40 = vshrl.u32 %v1504_v34, 4  ;;  %s1281_s15 = sld [smem:[#allocation2 + $0xa]] }
  0x1a   :  { %179 = vrot.lane.b32.xlu1 %v1457_v10, %s1409_s24  ;;  %v1479_v23 = vrot.slane %v297_v20, %v158_v7  ;;  %v299_v24 = vcombine.high %v297_v20, %v297_v20  ;;  %v1510_v37 = vmul.u32.u64.low 3435973837, %v1500_v32  ;;  %v1511_v38 = vmul.u32.u64.high 3435973837, %v1500_v32, %v1510_v37  ;;  %s1282_s16 = sld [smem:[#allocation2 + $0xb]] }
  0x1b   :  { %v1477_v22 = vrot.slane %v215_v19, %v158_v7  ;;  %v1487_v26 = vrot.slane %v257_v21, %v158_v7  ;;  %v44_v41 = vmul.u32 20, %v43_v39  ;;  %v54_v42 = vshrl.u32 %v1507_v36, 4  ;;  %s1287_s21 = sld [smem:[#allocation2 + $0x10]] }
  0x1c   :  { %177 = vrot.lane.b32.xlu0 %v1451_v9, %s1409_s24  ;;  %v1485_v25 = vrot.slane %v299_v24, %v158_v7  ;;  %v65_v43 = vshrl.u32 %v1511_v38, 4  ;;  %v77_v44 = vmul.u32 20, %v76_v40  ;;  %v249_v55 = vstv %s1274_s25  ;;  %s1284_s0 = sld [smem:[#allocation2 + $0xd]] }
  0x1d   :  { %v45_v45 = vsub.s32 %v1489_v27, %v44_v41  ;;  %v55_v46 = vmul.u32 20, %v54_v42  ;;  %v207_v58 = vstv %s141_s26  ;;  %v1536_v61 = vstv %s1277_s27  ;;  %s1290_s22 = sld [smem:[#allocation2 + $0x13]] }
  0x1e   :  { %175 = vrot.lane.b32.xlu1 %v1463_v13, %s1409_s24  ;;  %v66_v47 = vmul.u32 20, %v65_v43  ;;  %v78_v48 = vsub.s32 %v1492_v28, %v77_v44  ;;  %v273_v5 = vcombine.high %v1487_v26, %v1487_v26  ;;  %v282_v12 = vstv %s1276_s28  ;;  %s1283_s23 = sld [smem:[#allocation2 + $0xc]] }
  0x1f   :  { %vm93_vm0 = vcmp.ne.s32.totalorder %v45_v45, 0  ;;  %v56_v49 = vsub.s32 %v34_v31, %v55_v46  ;;  %vm105_vm5 = vcmp.ne.s32.totalorder %v45_v45, 19  ;;  %v272_v21 = vcombine.high %v1465_v14, %v1465_v14  ;;  %s1286_s25 = sld [smem:[#allocation2 + $0xf]] }
  0x20   :  { %190 = vrot.lane.b32.xlu0 %v1449_v8, %s1410_s1  ;;  %v67_v50 = vsub.s32 %v1500_v32, %v66_v47  ;;  %vm96_vm2 = vcmp.ne.s32.totalorder %v78_v48, 0  ;;  %v1522_v53 = vsel %vm93_vm0, 1.0, %v1411_v52  ;;  %v1558_v11 = vsel %vm105_vm5, 1.0, %v1411_v52  ;;  %s1289_s26 = sld [smem:[#allocation2 + $0x12]] }
  0x21   :  { %vm94_vm3 = vcmp.ne.s32.totalorder %v56_v49, 0  ;;  %v1527_v57 = vsel %vm96_vm2, 1.0, %v1411_v52  ;;  %vm108_vm7 = vcmp.ne.s32.totalorder %v78_v48, 19  ;;  %vm106_vm8 = vcmp.ne.s32.totalorder %v56_v49, 19  ;;  %s1288_s27 = sld [smem:[#allocation2 + $0x11]] }
  0x22   :  { %192 = vrot.lane.b32.xlu1 %v1463_v13, %s1410_s1  ;;  %vm95_vm4 = vcmp.ne.s32.totalorder %v67_v50, 0  ;;  %v1541_v63 = vsel %vm94_vm3, 1.0, %v1411_v52  ;;  %vm107_vm9 = vcmp.ne.s32.totalorder %v67_v50, 19  ;;  %v231_v31 = vcombine.high %v1477_v22, %v1477_v22  ;;  %s1285_s28 = sld [smem:[#allocation2 + $0xe]] }
  0x23   :  { %v1549_v2 = vsel %vm95_vm4, 1.0, %v1411_v52  ;;  %v1573_v35 = vsel %vm108_vm7, 1.0, %v1411_v52  ;;  %v1576_v36 = vsel %vm106_vm8, 1.0, %v1411_v52  ;;  %v240_v37 = vstv %s1529_s29  ;;  %s1291_s29 = sld [smem:[#allocation2 + $0x14]] }
  0x24   :  { %196 = vrot.lane.b32.xlu0 %v1457_v10, %s1410_s1  ;;  %v230_v40 = vcombine.high %v1473_v18, %v1473_v18  ;;  %v324_v41 = vstv %s1534_s30  ;;  %v1589_v45 = vsel %vm107_vm9, 1.0, %v1411_v52  ;;  %vm117_vm10 = vcmp.ge.s32.totalorder %v1489_v27, 20  ;;  %s1292_s30 = sld [smem:[#allocation2 + $0x15]] }
  0x25   :  { %vm346_vm11 = vcmp.lt.s32.totalorder %v1489_v27, 20  ;;  %vm367_vm12 = vcmp.lt.s32.totalorder %v1489_v27, 108  ;;  %vm131_vm13 = vcmp.lt.s32.totalorder %v1500_v32, 380  ;;  %vm84_vm14 = vcmp.lt.s32.totalorder %v1492_v28, 400 }
  0x26   :  { %194 = vrot.lane.b32.xlu1 %v1451_v9, %s1410_s1  ;;  %vm1238_vm0 = vcmask 7168   ;;  %vm1242_vm2 = vcmask 23552   ;;  %vm1244_vm3 = vcmask 25600  }
  0x8a   :  { %v174_v51 = vpop.permute.xlu0 %173 }
  0x8c   :  { %v180_v54 = vpop.permute.xlu1 %179 }
  0x8d   :  { %v185_v56 = vsel %vm181_vm1, %v180_v54, %v174_v51 }
  0x8e   :  { %v1532_v59 = vmul.f32 %v1522_v53, %v185_v56  ;;  %v178_v60 = vpop.permute.xlu0 %177 }
  0x8f   :  { %v182_v62 = vsel %vm181_vm1, %v178_v60, %v180_v54 }
  0x90   :  { %v250_v0 = vmul.f32 %v249_v55, %v1532_v59  ;;  %v1546_v1 = vmul.f32 %v1527_v57, %v182_v62  ;;  %v176_v3 = vpop.permute.xlu1 %175  ;;  %v208_v24 = vmul.f32 %v207_v58, %v1532_v59 }
  0x91   :  { %v183_v6 = vsel %vm181_vm1, %v176_v3, %v178_v60  ;;  %v184_v7 = vsel %vm181_vm1, %v174_v51, %v176_v3 }
  0x92   :  { %v1561_v15 = vadd.f32 %v1465_v14, %v250_v0  ;;  %v253_v16 = vmul.f32 %v249_v55, %v1546_v1  ;;  %v191_v17 = vpop.permute.xlu0 %190  ;;  %v187_v19 = vmul.f32 %v1541_v63, %v184_v7  ;;  %v188_v20 = vmul.f32 %v1549_v2, %v183_v6 }
  0x93   :  { %v211_v29 = vmul.f32 %v207_v58, %v1546_v1  ;;  %v236_v48 = vadd.f32 %v1473_v18, %v208_v24  ;;  %v292_v24 = vmul.f32 %v1536_v61, %v1532_v59 }
  0x94   :  { %v193_v30 = vpop.permute.xlu1 %192  ;;  %v281_v33 = vadd.f32 %v273_v5, %v253_v16  ;;  %v251_v34 = vmul.f32 %v249_v55, %v187_v19  ;;  %v209_v38 = vmul.f32 %v207_v58, %v187_v19  ;;  %v252_v42 = vmul.f32 %v249_v55, %v188_v20 }
  0x95   :  { %v201_v14 = vsel %vm198_vm6, %v191_v17, %v193_v30  ;;  %v239_v49 = vadd.f32 %v231_v31, %v211_v29  ;;  %v210_v54 = vmul.f32 %v207_v58, %v188_v20  ;;  %v293_v29 = vmul.f32 %v1536_v61, %v187_v19 }
  0x96   :  { %v197_v39 = vpop.permute.xlu0 %196  ;;  %v203_v43 = vmul.f32 %v1558_v11, %v201_v14  ;;  %v279_v51 = vadd.f32 %v272_v21, %v251_v34  ;;  %v237_v3 = vadd.f32 %v230_v40, %v209_v38  ;;  %v280_v18 = vadd.f32 %v1487_v26, %v252_v42 }
  0x97   :  { %v202_v44 = vsel %vm198_vm6, %v197_v39, %v191_v17  ;;  %v314_v31 = vcombine.high %v1479_v23, %v1479_v23  ;;  %v238_v26 = vadd.f32 %v1477_v22, %v210_v54  ;;  %v294_v42 = vmul.f32 %v1536_v61, %v188_v20 }
  0x98   :  { %v206_v46 = vmul.f32 %v1573_v35, %v202_v44  ;;  %v195_v47 = vpop.permute.xlu1 %194  ;;  %v241_v60 = vmul.f32 %v240_v37, %v203_v43  ;;  %v283_v5 = vmul.f32 %v282_v12, %v203_v43  ;;  %v325_v14 = vmul.f32 %v324_v41, %v203_v43 }
  0x99   :  { %v199_v55 = vsel %vm198_vm6, %v195_v47, %v197_v39  ;;  %v200_v56 = vsel %vm198_vm6, %v193_v30, %v195_v47  ;;  %v295_v44 = vmul.f32 %v1536_v61, %v1546_v1  ;;  %v321_v22 = vadd.f32 %v314_v31, %v293_v29 }
  0x9a   :  { %v204_v62 = vmul.f32 %v1576_v36, %v200_v56  ;;  %v205_v50 = vmul.f32 %v1589_v45, %v199_v55  ;;  %v244_v0 = vmul.f32 %v240_v37, %v206_v46  ;;  %v286_v6 = vmul.f32 %v282_v12, %v206_v46 }
  0x9b   :  { %v245_v7 = vadd.f32 %v241_v60, %v236_v48  ;;  %v287_v19 = vadd.f32 %v283_v5, %v1561_v15  ;;  %v315_v43 = vcombine.high %v1485_v25, %v1485_v25  ;;  %v322_v15 = vadd.f32 %v1485_v25, %v294_v42 }
  0x9c   :  { %v284_v16 = vmul.f32 %v282_v12, %v204_v62  ;;  %v285_v58 = vmul.f32 %v282_v12, %v205_v50  ;;  %v248_v17 = vadd.f32 %v244_v0, %v239_v49  ;;  %v242_v21 = vmul.f32 %v240_v37, %v204_v62 }
  0x9d   :  { %338 = vrot.lane.b32.xlu0 %v245_v7, %s1412_s5  ;;  %v243_v30 = vmul.f32 %v240_v37, %v205_v50  ;;  %v290_v39 = vadd.f32 %v286_v6, %v281_v33  ;;  %v326_v59 = vmul.f32 %v324_v41, %v204_v62  ;;  %v320_v37 = vadd.f32 %v1479_v23, %v292_v24 }
  0x9e   :  { %344 = vrot.lane.b32.xlu1 %v248_v17, %s1412_s5  ;;  %v246_v34 = vadd.f32 %v242_v21, %v237_v3  ;;  %v288_v12 = vadd.f32 %v284_v16, %v279_v51  ;;  %v289_v38 = vadd.f32 %v285_v58, %v280_v18  ;;  %v327_v47 = vmul.f32 %v324_v41, %v205_v50 }
  0x9f   :  { %v247_v40 = vadd.f32 %v243_v30, %v238_v26  ;;  %v329_v33 = vadd.f32 %v325_v14, %v320_v37  ;;  %v330_v48 = vadd.f32 %v326_v59, %v321_v22  ;;  %v328_v49 = vmul.f32 %v324_v41, %v206_v46 }
  0xa0   :  { %v323_v23 = vadd.f32 %v315_v43, %v295_v44  ;;  %v331_v20 = vadd.f32 %v327_v47, %v322_v15  ;;  %v1625_v46 = vsel %vm117_vm10, 1.0, %v1411_v52  ;;  %v333_v51 = vstv %s1280_s7 }
  0xa1   :  { %340 = vrot.lane.b32.xlu0 %v246_v34, %s1412_s5  ;;  %v334_v60 = vadd.f32 %v333_v51, %v287_v19  ;;  %v335_v5 = vadd.f32 %v333_v51, %v288_v12  ;;  %v336_v58 = vadd.f32 %v333_v51, %v289_v38  ;;  %v1643_v24 = vsel %vm131_vm13, 1.0, %v1411_v52 }
  0xa2   :  { %342 = vrot.lane.b32.xlu1 %v247_v40, %s1412_s5  ;;  %v332_v61 = vadd.f32 %v328_v49, %v323_v23  ;;  %v337_v29 = vadd.f32 %v333_v51, %v290_v39  ;;  %v1660_v59 = vsel %vm84_vm14, 1.0, %v1411_v52 }
  0xa5   :  { %359 = vrot.lane.b32.xlu0 %v329_v33, %s1413_s6 }
  0xa6   :  { %361 = vrot.lane.b32.xlu1 %v330_v48, %s1413_s6 }
  0xa9   :  { %363 = vrot.lane.b32.xlu0 %v331_v20, %s1413_s6 }
  0xaa   :  { %365 = vrot.lane.b32.xlu1 %v332_v61, %s1413_s6 }
 0x10f   :  { %v339_v1 = vpop.permute.xlu0 %338 }
 0x110   :  { %v345_v41 = vpop.permute.xlu1 %344 }
 0x111   :  { %v350_v25 = vsel %vm346_vm11, %v345_v41, %v339_v1 }
 0x112   :  { %v351_v55 = vmul.f32 %v1625_v46, %v350_v25 }
 0x113   :  { %v341_v54 = vpop.permute.xlu0 %340 }
 0x114   :  { %v343_v56 = vpop.permute.xlu1 %342  ;;  %v349_v50 = vsel %vm346_vm11, %v339_v1, %v341_v54  ;;  %v355_v0 = vadd.f32 %v351_v55, %v334_v60 }
 0x115   :  { %v348_v7 = vsel %vm346_vm11, %v341_v54, %v343_v56  ;;  %v356_v16 = vadd.f32 %v349_v50, %v335_v5  ;;  %v347_v17 = vsel %vm346_vm11, %v343_v56, %v345_v41 }
 0x116   :  { %v357_v31 = vadd.f32 %v348_v7, %v336_v58  ;;  %v358_v38 = vadd.f32 %v347_v17, %v337_v29 }
 0x117   :  { %v360_v62 = vpop.permute.xlu0 %359 }
 0x118   :  { %v362_v3 = vpop.permute.xlu1 %361 }
 0x119   :  { %v370_v6 = vsel %vm367_vm12, %v360_v62, %v362_v3 }
 0x11a   :  { %v1638_v18 = vadd.f32 %v370_v6, %v355_v0 }
 0x11b   :  { %v364_v21 = vpop.permute.xlu0 %363 }
 0x11c   :  { %v369_v32 = vsel %vm367_vm12, %v362_v3, %v364_v21  ;;  %v366_v30 = vpop.permute.xlu1 %365  ;;  %v403_v14 = vmul.f32 %v1638_v18, %v1638_v18  ;;  %v387_v44 = vsel %vm386_vm15, %v1638_v18, 0.0 }
 0x11d   :  { %v1648_v34 = vadd.f32 %v369_v32, %v356_v16  ;;  %v368_v26 = vsel %vm367_vm12, %v364_v21, %v366_v30  ;;  %v371_v12 = vsel %vm367_vm12, %v366_v30, %v360_v62 }
 0x11e   :  { %v374_v39 = vmul.f32 %v1643_v24, %v368_v26  ;;  %v375_v40 = vmul.f32 0.0, %v371_v12  ;;  %v407_v49 = vsel %vm386_vm15, %v403_v14, 0.0 }
 0x11f   :  { %v404_v28 = vmul.f32 %v1648_v34, %v1648_v34  ;;  %v388_v19 = vsel %vm386_vm15, %v1648_v34, 0.0 }
 0x120   :  { %v378_v42 = vadd.f32 %v374_v39, %v357_v31  ;;  %v379_v37 = vadd.f32 %v375_v40, %v358_v38  ;;  %v389_v22 = vadd.f32 %v388_v19, %v387_v44 }
 0x121   :  { %v408_v43 = vsel %vm386_vm15, %v404_v28, 0.0 }
 0x122   :  { %v383_v33 = vmul.f32 %v1660_v59, %v379_v37  ;;  %v390_v47 = vsel %vm386_vm15, %v378_v42, 0.0  ;;  %v405_v48 = vmul.f32 %v378_v42, %v378_v42  ;;  %v409_v15 = vadd.f32 %v408_v43, %v407_v49 }
 0x123   :  { %v391_v52 = vadd.f32 %v390_v47, %v389_v22  ;;  %v522_v49 = vstv %s1287_s21  ;;  %s1296_s21 = sld [smem:[#allocation2 + $0x19]] }
 0x124   :  { %v392_v23 = vsel %vm386_vm15, %v383_v33, 0.0  ;;  %v406_v20 = vmul.f32 %v383_v33, %v383_v33  ;;  %v410_v61 = vsel %vm386_vm15, %v405_v48, 0.0 }
 0x125   :  { %v393_v1 = vadd.f32 %v392_v23, %v391_v52  ;;  %v411_v41 = vadd.f32 %v410_v61, %v409_v15  ;;  %v1700_v52 = vstv %s1284_s0  ;;  %v1702_v15 = vstv %s1290_s22  ;;  %s1302_s0 = sld [smem:[#allocation2 + $0x1f]] }
 0x126   :  { %v412_v25 = vsel %vm386_vm15, %v406_v20, 0.0  ;;  %v494_v23 = vstv %s1283_s23  ;;  %v517_v20 = vstv %s1286_s25  ;;  %v1704_v61 = vstv %s1289_s26  ;;  %s1295_s22 = sld [smem:[#allocation2 + $0x18]] }
 0x127   :  { %394 = vadd.xlane.f32.xlu0 %v393_v1  ;;  %v413_v51 = vadd.f32 %v412_v25, %v411_v41  ;;  %s1298_s23 = sld [smem:[#allocation2 + $0x1b]] }
 0x128   :  { %s1301_s25 = sld [smem:[#allocation2 + $0x1e]] }
 0x129   :  { %414 = vadd.xlane.f32.xlu1 %v413_v51  ;;  %s1300_s26 = sld [smem:[#allocation2 + $0x1d]] }
 0x1b0   :  { %v395_v54 = vpop.xlane.xlu0 %394 }
 0x1b1   :  { %v396_v55 = vrot.slane %v395_v54, 4 }
 0x1b2   :  { %v415_v56 = vpop.xlane.xlu1 %414 }
 0x1b3   :  { %v397_v60 = vadd.f32 %v396_v55, %v395_v54  ;;  %v416_v62 = vrot.slane %v415_v56, 4  ;;  %v531_v55 = vstv %s1288_s27  ;;  %s1297_s27 = sld [smem:[#allocation2 + $0x1a]] }
 0x1b5   :  { %v398_v50 = vrot.slane %v397_v60, 2  ;;  %v417_v0 = vadd.f32 %v416_v62, %v415_v56 }
 0x1b7   :  { %v418_v3 = vrot.slane %v417_v0, 2  ;;  %v399_v5 = vadd.f32 %v398_v50, %v397_v60 }
 0x1b9   :  { %v400_v6 = vrot.slane %v399_v5, 1  ;;  %v419_v7 = vadd.f32 %v418_v3, %v417_v0  ;;  %v508_v3 = vstv %s1285_s28  ;;  %s1824_s28 = sld [smem:[#allocation2 + $0x20]] }
 0x1bb   :  { %v401_v16 = vadd.f32 %v400_v6, %v399_v5  ;;  %v420_v58 = vrot.slane %v419_v7, 1 }
 0x1bd   :  { %1330 = vpush %v401_v16  ;;  %v421_v17 = vadd.f32 %v420_v58, %v419_v7  ;;  %v1722_v7 = vstv %s1291_s29 }
 0x1bf   :  { %1332 = vpush %v421_v17 }
 0x1ee   :  { %s1331_s8 = spop %1330 }
 0x1ef   :  { %s423_s9 = smul.f32 0.00125, %s1331_s8 }
 0x1f0   :  { %s1333_s10 = spop %1332 }
 0x1f1   :  { %s425_s11 = smul.f32 %s423_s9, %s423_s9 }
 0x1f2   :  { %s424_s12 = smul.f32 0.00125, %s1333_s10 }
 0x1f4   :  { %s426_s13 = ssub.f32 %s424_s12, %s425_s11 }
 0x1f6   :  { %s427_s14 = sadd.f32 1e-05, %s426_s13 }
 0x1f8   :  { %v428_v21 = vstv %s427_s14  ;;  %s1293_s14 = sld [smem:[#allocation2 + $0x16]] }
 0x1f9   :  { %1357 = vrsqrt.f32 %v428_v21 }
 0x206   :  { %v1358_v29 = vpop.eup %1357 }
 0x207   :  { %1334 = vpush %v1358_v29 }
 0x238   :  { %s1335_s17 = spop %1334 }
 0x239   :  { %s431_s18 = smul.f32 %s1335_s17, %s1281_s15  ;;  %s1294_s15 = sld [smem:[#allocation2 + $0x17]] }
 0x23b   :  { %s432_s19 = smul.f32 %s431_s18, %s423_s9  ;;  %v434_v32 = vstv %s431_s18 }
 0x23c   :  { %v435_v30 = vmul.f32 %v434_v32, %v1638_v18  ;;  %v437_v31 = vmul.f32 %v434_v32, %v378_v42  ;;  %v436_v12 = vmul.f32 %v434_v32, %v1648_v34  ;;  %v438_v38 = vmul.f32 %v434_v32, %v383_v33 }
 0x23d   :  { %s433_s20 = ssub.f32 %s1282_s16, %s432_s19 }
 0x23f   :  { %v439_v26 = vstv %s433_s20  ;;  %s1299_s20 = sld [smem:[#allocation2 + $0x1c]] }
 0x240   :  { %v440_v14 = vadd.f32 %v439_v26, %v435_v30  ;;  %v442_v39 = vadd.f32 %v439_v26, %v437_v31  ;;  %v441_v40 = vadd.f32 %v439_v26, %v436_v12  ;;  %v443_v28 = vadd.f32 %v439_v26, %v438_v38 }
 0x242   :  { %v1675_v19 = vmax.f32 %v440_v14, 0.0  ;;  %v1677_v37 = vmax.f32 %v442_v39, 0.0  ;;  %v445_v18 = vmax.f32 %v441_v40, 0.0  ;;  %v447_v42 = vmax.f32 %v443_v28, 0.0 }
 0x244   :  { %466 = vrot.lane.b32.xlu1 %v1677_v37, %s1409_s24  ;;  %462 = vrot.lane.b32.xlu0 %v1675_v19, %s1409_s24  ;;  %v1687_v34 = vmul.f32 %v1660_v59, %v447_v42  ;;  %v523_v54 = vmul.f32 %v522_v49, %v1675_v19  ;;  %v501_v56 = vmul.f32 %v1700_v52, %v445_v18 }
 0x245   :  { %v502_v60 = vmul.f32 %v1700_v52, %v1677_v37  ;;  %v547_v62 = vmul.f32 %v1702_v15, %v445_v18  ;;  %v500_v5 = vmul.f32 %v1700_v52, %v1675_v19  ;;  %v525_v16 = vmul.f32 %v522_v49, %v1677_v37 }
 0x246   :  { %v524_v58 = vmul.f32 %v522_v49, %v445_v18  ;;  %v526_v31 = vmul.f32 %v522_v49, %v1687_v34 }
 0x248   :  { %464 = vrot.lane.b32.xlu1 %v445_v18, %s1409_s24  ;;  %478 = vrot.lane.b32.xlu0 %v1675_v19, %s1410_s1 }
 0x24c   :  { %480 = vrot.lane.b32.xlu1 %v445_v18, %s1410_s1  ;;  %468 = vrot.lane.b32.xlu0 %v1687_v34, %s1409_s24 }
 0x250   :  { %482 = vrot.lane.b32.xlu1 %v1677_v37, %s1410_s1  ;;  %484 = vrot.lane.b32.xlu0 %v1687_v34, %s1410_s1 }
 0x2b6   :  { %v467_v44 = vpop.permute.xlu1 %466  ;;  %v463_v22 = vpop.permute.xlu0 %462 }
 0x2ba   :  { %v465_v43 = vpop.permute.xlu1 %464  ;;  %v479_v33 = vpop.permute.xlu0 %478 }
 0x2bb   :  { %v471_v47 = vsel %vm181_vm1, %v465_v43, %v467_v44  ;;  %v472_v48 = vsel %vm181_vm1, %v463_v22, %v465_v43 }
 0x2bc   :  { %v475_v1 = vmul.f32 %v1541_v63, %v472_v48  ;;  %v1708_v41 = vmul.f32 %v1549_v2, %v471_v47 }
 0x2be   :  { %v481_v25 = vpop.permute.xlu1 %480  ;;  %v469_v51 = vpop.permute.xlu0 %468  ;;  %v496_v17 = vmul.f32 %v494_v23, %v475_v1  ;;  %v497_v21 = vmul.f32 %v494_v23, %v1708_v41  ;;  %v519_v26 = vmul.f32 %v517_v20, %v475_v1  ;;  %v520_v47 = vmul.f32 %v517_v20, %v1708_v41 }
 0x2bf   :  { %v470_v50 = vsel %vm181_vm1, %v467_v44, %v469_v51  ;;  %v473_v0 = vsel %vm181_vm1, %v469_v51, %v463_v22  ;;  %v488_v29 = vsel %vm198_vm6, %v479_v33, %v481_v25  ;;  %v542_v48 = vmul.f32 %v1704_v61, %v475_v1 }
 0x2c0   :  { %v474_v6 = vmul.f32 %v1522_v53, %v473_v0  ;;  %v477_v12 = vmul.f32 %v1527_v57, %v470_v50  ;;  %v490_v42 = vmul.f32 %v1558_v11, %v488_v29  ;;  %v505_v49 = vadd.f32 %v501_v56, %v496_v17 }
 0x2c1   :  { %v506_v0 = vadd.f32 %v502_v60, %v497_v21  ;;  %v546_v1 = vmul.f32 %v1702_v15, %v1675_v19  ;;  %v528_v56 = vadd.f32 %v524_v58, %v519_v26  ;;  %v551_v60 = vadd.f32 %v547_v62, %v542_v48 }
 0x2c2   :  { %v483_v32 = vpop.permute.xlu1 %482  ;;  %v485_v30 = vpop.permute.xlu0 %484  ;;  %v518_v38 = vmul.f32 %v517_v20, %v474_v6  ;;  %v495_v39 = vmul.f32 %v494_v23, %v474_v6  ;;  %v521_v51 = vmul.f32 %v517_v20, %v477_v12  ;;  %v541_v50 = vmul.f32 %v1704_v61, %v474_v6 }
 0x2c3   :  { %v487_v14 = vsel %vm198_vm6, %v481_v25, %v483_v32  ;;  %v486_v28 = vsel %vm198_vm6, %v483_v32, %v485_v30  ;;  %v489_v18 = vsel %vm198_vm6, %v485_v30, %v479_v33  ;;  %v509_v4 = vmul.f32 %v508_v3, %v490_v42 }
 0x2c4   :  { %v491_v40 = vmul.f32 %v1576_v36, %v487_v14  ;;  %v527_v44 = vadd.f32 %v523_v54, %v518_v38  ;;  %v492_v22 = vmul.f32 %v1589_v45, %v486_v28  ;;  %v493_v43 = vmul.f32 %v1573_v35, %v489_v18 }
 0x2c5   :  { %v504_v29 = vadd.f32 %v500_v5, %v495_v39  ;;  %v532_v54 = vmul.f32 %v531_v55, %v490_v42  ;;  %v529_v20 = vadd.f32 %v525_v16, %v520_v47  ;;  %v498_v6 = vmul.f32 %v494_v23, %v477_v12 }
 0x2c6   :  { %v510_v25 = vmul.f32 %v508_v3, %v491_v40  ;;  %v511_v32 = vmul.f32 %v508_v3, %v492_v22  ;;  %v533_v14 = vmul.f32 %v531_v55, %v491_v40  ;;  %v534_v33 = vmul.f32 %v531_v55, %v492_v22 }
 0x2c7   :  { %v535_v38 = vmul.f32 %v531_v55, %v493_v43  ;;  %v556_v18 = vmul.f32 %v1722_v7, %v491_v40  ;;  %v530_v17 = vadd.f32 %v526_v31, %v521_v51  ;;  %v536_v21 = vadd.f32 %v532_v54, %v527_v44 }
 0x2c8   :  { %v514_v30 = vadd.f32 %v510_v25, %v505_v49  ;;  %v515_v28 = vadd.f32 %v511_v32, %v506_v0  ;;  %v513_v5 = vadd.f32 %v509_v4, %v504_v29  ;;  %v550_v39 = vadd.f32 %v546_v1, %v541_v50 }
 0x2c9   :  { %v538_v55 = vadd.f32 %v534_v33, %v529_v20  ;;  %v537_v49 = vadd.f32 %v533_v14, %v528_v56  ;;  %v560_v25 = vadd.f32 %v556_v18, %v551_v60  ;;  %v503_v40 = vmul.f32 %v1700_v52, %v1687_v34 }
 0x2ca   :  { %570 = vrot.lane.b32.xlu0 %v514_v30, %s1412_s5  ;;  %572 = vrot.lane.b32.xlu1 %v515_v28, %s1412_s5  ;;  %v512_v0 = vmul.f32 %v508_v3, %v493_v43  ;;  %v539_v32 = vadd.f32 %v535_v38, %v530_v17  ;;  %v543_v19 = vmul.f32 %v1704_v61, %v1708_v41 }
 0x2cb   :  { %v555_v23 = vmul.f32 %v1722_v7, %v490_v42  ;;  %v544_v62 = vmul.f32 %v1704_v61, %v477_v12  ;;  %v507_v4 = vadd.f32 %v503_v40, %v498_v6  ;;  %v548_v58 = vmul.f32 %v1702_v15, %v1677_v37 }
 0x2cc   :  { %v557_v52 = vmul.f32 %v1722_v7, %v492_v22  ;;  %v549_v31 = vmul.f32 %v1702_v15, %v1687_v34  ;;  %v558_v41 = vmul.f32 %v1722_v7, %v493_v43  ;;  %v563_v34 = vstv %s1292_s30 }
 0x2cd   :  { %v559_v16 = vadd.f32 %v555_v23, %v550_v39  ;;  %v516_v3 = vadd.f32 %v512_v0, %v507_v4  ;;  %v552_v26 = vadd.f32 %v548_v58, %v543_v19  ;;  %v565_v51 = vadd.f32 %v563_v34, %v537_v49 }
 0x2ce   :  { %568 = vrot.lane.b32.xlu0 %v513_v5, %s1412_s5  ;;  %590 = vrot.lane.b32.xlu1 %v560_v25, %s1413_s6  ;;  %v553_v61 = vadd.f32 %v549_v31, %v544_v62  ;;  %v566_v14 = vadd.f32 %v563_v34, %v538_v55  ;;  %v564_v30 = vadd.f32 %v563_v34, %v536_v21 }
 0x2cf   :  { %v561_v12 = vadd.f32 %v557_v52, %v552_v26  ;;  %v567_v18 = vadd.f32 %v563_v34, %v539_v32 }
 0x2d0   :  { %v562_v42 = vadd.f32 %v558_v41, %v553_v61 }
 0x2d2   :  { %588 = vrot.lane.b32.xlu0 %v559_v16, %s1413_s6  ;;  %574 = vrot.lane.b32.xlu1 %v516_v3, %s1412_s5 }
 0x2d6   :  { %592 = vrot.lane.b32.xlu0 %v561_v12, %s1413_s6  ;;  %594 = vrot.lane.b32.xlu1 %v562_v42, %s1413_s6 }
 0x33c   :  { %v571_v37 = vpop.permute.xlu0 %570  ;;  %v573_v44 = vpop.permute.xlu1 %572 }
 0x33d   :  { %v577_v48 = vsel %vm346_vm11, %v571_v37, %v573_v44 }
 0x33e   :  { %v586_v28 = vadd.f32 %v577_v48, %v566_v14 }
 0x340   :  { %v569_v22 = vpop.permute.xlu0 %568  ;;  %v591_v47 = vpop.permute.xlu1 %590 }
 0x341   :  { %v578_v7 = vsel %vm346_vm11, %v569_v22, %v571_v37 }
 0x342   :  { %v585_v29 = vadd.f32 %v578_v7, %v565_v51 }
 0x344   :  { %v589_v15 = vpop.permute.xlu0 %588  ;;  %v575_v43 = vpop.permute.xlu1 %574 }
 0x345   :  { %v579_v50 = vsel %vm346_vm11, %v575_v43, %v569_v22  ;;  %v576_v54 = vsel %vm346_vm11, %v573_v44, %v575_v43  ;;  %v598_v6 = vsel %vm367_vm12, %v589_v15, %v591_v47 }
 0x346   :  { %v580_v33 = vmul.f32 %v1625_v46, %v579_v50  ;;  %v587_v5 = vadd.f32 %v576_v54, %v567_v18 }
 0x348   :  { %v593_v38 = vpop.permute.xlu0 %592  ;;  %v584_v1 = vadd.f32 %v580_v33, %v564_v30  ;;  %v595_v20 = vpop.permute.xlu1 %594 }
 0x349   :  { %v597_v56 = vsel %vm367_vm12, %v591_v47, %v593_v38  ;;  %v599_v60 = vsel %vm367_vm12, %v595_v20, %v589_v15  ;;  %v596_v17 = vsel %vm367_vm12, %v593_v38, %v595_v20 }
 0x34a   :  { %v1783_v21 = vadd.f32 %v597_v56, %v585_v29  ;;  %v604_v39 = vadd.f32 %v598_v6, %v584_v1  ;;  %v603_v55 = vmul.f32 0.0, %v599_v60  ;;  %v602_v49 = vmul.f32 %v1643_v24, %v596_v17 }
 0x34c   :  { %v631_v25 = vmul.f32 %v1783_v21, %v1783_v21  ;;  %v615_v40 = vsel %vm386_vm15, %v1783_v21, 0.0  ;;  %v630_v0 = vmul.f32 %v604_v39, %v604_v39  ;;  %v607_v32 = vadd.f32 %v603_v55, %v587_v5 }
 0x34d   :  { %v606_v19 = vadd.f32 %v602_v49, %v586_v28  ;;  %v614_v23 = vsel %vm386_vm15, %v604_v39, 0.0 }
 0x34e   :  { %v616_v62 = vadd.f32 %v615_v40, %v614_v23  ;;  %v635_v4 = vsel %vm386_vm15, %v631_v25, 0.0  ;;  %v611_v16 = vmul.f32 %v1660_v59, %v607_v32  ;;  %v634_v3 = vsel %vm386_vm15, %v630_v0, 0.0 }
 0x34f   :  { %v617_v58 = vsel %vm386_vm15, %v606_v19, 0.0  ;;  %v632_v52 = vmul.f32 %v606_v19, %v606_v19  ;;  %v636_v41 = vadd.f32 %v635_v4, %v634_v3  ;;  %v1830_v3 = vstv %s1296_s21 }
 0x350   :  { %v618_v31 = vadd.f32 %v617_v58, %v616_v62  ;;  %v619_v26 = vsel %vm386_vm15, %v611_v16, 0.0  ;;  %v633_v61 = vmul.f32 %v611_v16, %v611_v16 }
 0x351   :  { %v637_v12 = vsel %vm386_vm15, %v632_v52, 0.0  ;;  %v753_v52 = vstv %s1299_s20 }
 0x352   :  { %v620_v42 = vadd.f32 %v619_v26, %v618_v31  ;;  %v638_v37 = vadd.f32 %v637_v12, %v636_v41  ;;  %v639_v44 = vsel %vm386_vm15, %v633_v61, 0.0  ;;  %v1832_v31 = vstv %s1302_s0 }
 0x353   :  { %v725_v41 = vstv %s1295_s22  ;;  %v748_v26 = vstv %s1298_s23  ;;  %v1834_v61 = vstv %s1301_s25 }
 0x354   :  { %621 = vadd.xlane.f32.xlu0 %v620_v42  ;;  %v640_v22 = vadd.f32 %v639_v44, %v638_v37 }
 0x356   :  { %641 = vadd.xlane.f32.xlu1 %v640_v22 }
 0x3dd   :  { %v622_v47 = vpop.xlane.xlu0 %621 }
 0x3de   :  { %v623_v34 = vrot.slane %v622_v47, 4 }
 0x3df   :  { %v642_v15 = vpop.xlane.xlu1 %641 }
 0x3e0   :  { %v624_v7 = vadd.f32 %v623_v34, %v622_v47  ;;  %v643_v43 = vrot.slane %v642_v15, 4  ;;  %v762_v47 = vstv %s1300_s26 }
 0x3e2   :  { %v625_v48 = vrot.slane %v624_v7, 2  ;;  %v644_v51 = vadd.f32 %v643_v43, %v642_v15 }
 0x3e4   :  { %v645_v50 = vrot.slane %v644_v51, 2  ;;  %v626_v14 = vadd.f32 %v625_v48, %v624_v7 }
 0x3e6   :  { %v627_v33 = vrot.slane %v626_v14, 1  ;;  %v646_v30 = vadd.f32 %v645_v50, %v644_v51  ;;  %v739_v50 = vstv %s1297_s27 }
 0x3e8   :  { %v628_v29 = vadd.f32 %v627_v33, %v626_v14  ;;  %v647_v54 = vrot.slane %v646_v30, 1 }
 0x3ea   :  { %1336 = vpush %v628_v29  ;;  %v648_v38 = vadd.f32 %v647_v54, %v646_v30 }
 0x3ec   :  { %1338 = vpush %v648_v38 }
 0x41b   :  { %s1337_s7 = spop %1336 }
 0x41c   :  { %s650_s8 = smul.f32 0.00125, %s1337_s7 }
 0x41d   :  { %s1339_s9 = spop %1338 }
 0x41e   :  { %s652_s10 = smul.f32 %s650_s8, %s650_s8 }
 0x41f   :  { %s651_s11 = smul.f32 0.00125, %s1339_s9  ;;  %s1305_s9 = sld [smem:[#allocation2 + $0x22]] }
 0x421   :  { %s653_s12 = ssub.f32 %s651_s11, %s652_s10 }
 0x422   :  { %s1942_s10 = sld [smem:[#allocation2 + $0x23]] }
 0x423   :  { %s654_s13 = sadd.f32 1e-05, %s653_s12 }
 0x425   :  { %v655_v28 = vstv %s654_s13 }
 0x426   :  { %1359 = vrsqrt.f32 %v655_v28 }
 0x433   :  { %v1360_v18 = vpop.eup %1359 }
 0x434   :  { %1340 = vpush %v1360_v18  ;;  %v785_v18 = vstv %s1824_s28 }
 0x465   :  { %s1341_s16 = spop %1340 }
 0x466   :  { %s658_s17 = smul.f32 %s1341_s16, %s1293_s14 }
 0x468   :  { %s659_s18 = smul.f32 %s658_s17, %s650_s8  ;;  %v661_v1 = vstv %s658_s17 }
 0x469   :  { %v662_v20 = vmul.f32 %v661_v1, %v604_v39  ;;  %v663_v56 = vmul.f32 %v661_v1, %v1783_v21  ;;  %v664_v6 = vmul.f32 %v661_v1, %v606_v19  ;;  %v665_v60 = vmul.f32 %v661_v1, %v611_v16 }
 0x46a   :  { %s660_s19 = ssub.f32 %s1294_s15, %s659_s18 }
 0x46c   :  { %v666_v17 = vstv %s660_s19 }
 0x46d   :  { %v667_v5 = vadd.f32 %v666_v17, %v662_v20  ;;  %v668_v55 = vadd.f32 %v666_v17, %v663_v56  ;;  %v669_v49 = vadd.f32 %v666_v17, %v664_v6  ;;  %v670_v25 = vadd.f32 %v666_v17, %v665_v60 }
 0x46f   :  { %v671_v40 = vmax.f32 %v667_v5, 0.0  ;;  %v673_v0 = vmax.f32 %v669_v49, 0.0  ;;  %v672_v32 = vmax.f32 %v668_v55, 0.0  ;;  %v674_v23 = vmax.f32 %v670_v25, 0.0 }
 0x471   :  { %v1800_v62 = vadd.f32 %v671_v40, %v1449_v8  ;;  %v1803_v4 = vadd.f32 %v673_v0, %v1451_v9  ;;  %v678_v21 = vmul.f32 %v1660_v59, %v674_v23  ;;  %v680_v39 = vadd.f32 %v672_v32, %v1463_v13 }
 0x473   :  { %697 = vrot.lane.b32.xlu1 %v1803_v4, %s1409_s24  ;;  %693 = vrot.lane.b32.xlu0 %v1800_v62, %s1409_s24  ;;  %v1815_v8 = vadd.f32 %v678_v21, %v1457_v10  ;;  %v754_v22 = vmul.f32 %v753_v52, %v1800_v62  ;;  %v732_v34 = vmul.f32 %v1830_v3, %v680_v39 }
 0x474   :  { %v733_v15 = vmul.f32 %v1830_v3, %v1803_v4  ;;  %v778_v7 = vmul.f32 %v1832_v31, %v680_v39  ;;  %v756_v48 = vmul.f32 %v753_v52, %v1803_v4  ;;  %v755_v14 = vmul.f32 %v753_v52, %v680_v39 }
 0x475   :  { %v757_v33 = vmul.f32 %v753_v52, %v1815_v8 }
 0x477   :  { %695 = vrot.lane.b32.xlu1 %v680_v39, %s1409_s24  ;;  %709 = vrot.lane.b32.xlu0 %v1800_v62, %s1410_s1 }
 0x47b   :  { %711 = vrot.lane.b32.xlu1 %v680_v39, %s1410_s1  ;;  %699 = vrot.lane.b32.xlu0 %v1815_v8, %s1409_s24  ;;  %s1304_s24 = sld [smem:[#allocation2 + $0x21]] }
 0x47f   :  { %713 = vrot.lane.b32.xlu1 %v1803_v4, %s1410_s1  ;;  %715 = vrot.lane.b32.xlu0 %v1815_v8, %s1410_s1 }
 0x4e5   :  { %v698_v9 = vpop.permute.xlu1 %697  ;;  %v694_v13 = vpop.permute.xlu0 %693 }
 0x4e9   :  { %v696_v10 = vpop.permute.xlu1 %695  ;;  %v710_v19 = vpop.permute.xlu0 %709 }
 0x4ea   :  { %v702_v16 = vsel %vm181_vm1, %v696_v10, %v698_v9  ;;  %v703_v58 = vsel %vm181_vm1, %v694_v13, %v696_v10 }
 0x4eb   :  { %v706_v12 = vmul.f32 %v1541_v63, %v703_v58  ;;  %v1838_v42 = vmul.f32 %v1549_v2, %v702_v16  ;;  %v731_v2 = vmul.f32 %v1830_v3, %v1800_v62 }
 0x4ed   :  { %v712_v37 = vpop.permute.xlu1 %711  ;;  %v700_v44 = vpop.permute.xlu0 %699  ;;  %v727_v30 = vmul.f32 %v725_v41, %v706_v12  ;;  %v728_v29 = vmul.f32 %v725_v41, %v1838_v42  ;;  %v750_v1 = vmul.f32 %v748_v26, %v706_v12  ;;  %v751_v40 = vmul.f32 %v748_v26, %v1838_v42 }
 0x4ee   :  { %v701_v43 = vsel %vm181_vm1, %v698_v9, %v700_v44  ;;  %v704_v63 = vsel %vm181_vm1, %v700_v44, %v694_v13  ;;  %v719_v54 = vsel %vm198_vm6, %v710_v19, %v712_v37  ;;  %v773_v0 = vmul.f32 %v1834_v61, %v706_v12 }
 0x4ef   :  { %v705_v51 = vmul.f32 %v1522_v53, %v704_v63  ;;  %v708_v20 = vmul.f32 %v1527_v57, %v701_v43  ;;  %v721_v55 = vmul.f32 %v1558_v11, %v719_v54  ;;  %v736_v32 = vadd.f32 %v732_v34, %v727_v30 }
 0x4f0   :  { %v737_v39 = vadd.f32 %v733_v15, %v728_v29  ;;  %v777_v12 = vmul.f32 %v1832_v31, %v1800_v62  ;;  %v734_v30 = vmul.f32 %v1830_v3, %v1815_v8  ;;  %v774_v62 = vmul.f32 %v1834_v61, %v1838_v42 }
 0x4f1   :  { %v714_v38 = vpop.permute.xlu1 %713  ;;  %v716_v28 = vpop.permute.xlu0 %715  ;;  %v749_v56 = vmul.f32 %v748_v26, %v705_v51  ;;  %v726_v6 = vmul.f32 %v725_v41, %v705_v51  ;;  %v772_v21 = vmul.f32 %v1834_v61, %v705_v51  ;;  %v763_v16 = vmul.f32 %v762_v47, %v721_v55 }
 0x4f2   :  { %v718_v53 = vsel %vm198_vm6, %v712_v37, %v714_v38  ;;  %v717_v17 = vsel %vm198_vm6, %v714_v38, %v716_v28  ;;  %v720_v5 = vsel %vm198_vm6, %v716_v28, %v710_v19  ;;  %v760_v37 = vadd.f32 %v756_v48, %v751_v40 }
 0x4f3   :  { %v722_v60 = vmul.f32 %v1576_v36, %v718_v53  ;;  %v758_v49 = vadd.f32 %v754_v22, %v749_v56  ;;  %v723_v25 = vmul.f32 %v1589_v45, %v717_v17  ;;  %v724_v57 = vmul.f32 %v1573_v35, %v720_v5 }
 0x4f4   :  { %v752_v36 = vmul.f32 %v748_v26, %v708_v20  ;;  %v735_v11 = vadd.f32 %v731_v2, %v726_v6  ;;  %v740_v35 = vmul.f32 %v739_v50, %v721_v55  ;;  %v759_v26 = vadd.f32 %v755_v14, %v750_v1 }
 0x4f5   :  { %v741_v23 = vmul.f32 %v739_v50, %v722_v60  ;;  %v742_v9 = vmul.f32 %v739_v50, %v723_v25  ;;  %v764_v13 = vmul.f32 %v762_v47, %v722_v60  ;;  %v765_v10 = vmul.f32 %v762_v47, %v723_v25 }
 0x4f6   :  { %v766_v58 = vmul.f32 %v762_v47, %v724_v57  ;;  %v787_v52 = vmul.f32 %v785_v18, %v722_v60  ;;  %v729_v44 = vmul.f32 %v725_v41, %v708_v20  ;;  %v782_v22 = vadd.f32 %v778_v7, %v773_v0 }
 0x4f7   :  { %v745_v19 = vadd.f32 %v741_v23, %v736_v32  ;;  %v746_v45 = vadd.f32 %v742_v9, %v737_v39  ;;  %v761_v34 = vadd.f32 %v757_v33, %v752_v36  ;;  %v767_v15 = vadd.f32 %v763_v16, %v758_v49 }
 0x4f8   :  { %v744_v43 = vadd.f32 %v740_v35, %v735_v11  ;;  %v781_v63 = vadd.f32 %v777_v12, %v772_v21  ;;  %v769_v2 = vadd.f32 %v765_v10, %v760_v37  ;;  %v768_v47 = vadd.f32 %v764_v13, %v759_v26 }
 0x4f9   :  { %801 = vrot.lane.b32.xlu0 %v745_v19, %s1412_s5  ;;  %803 = vrot.lane.b32.xlu1 %v746_v45, %s1412_s5  ;;  %v791_v51 = vadd.f32 %v787_v52, %v782_v22  ;;  %v743_v29 = vmul.f32 %v739_v50, %v724_v57  ;;  %v770_v54 = vadd.f32 %v766_v58, %v761_v34  ;;  %v794_v60 = vstv %s1304_s24 }
 0x4fa   :  { %v786_v41 = vmul.f32 %v785_v18, %v721_v55  ;;  %v775_v7 = vmul.f32 %v1834_v61, %v708_v20  ;;  %v738_v48 = vadd.f32 %v734_v30, %v729_v44  ;;  %v779_v33 = vmul.f32 %v1832_v31, %v1803_v4 }
 0x4fb   :  { %v788_v38 = vmul.f32 %v785_v18, %v723_v25  ;;  %v780_v3 = vmul.f32 %v1832_v31, %v1815_v8  ;;  %v789_v50 = vmul.f32 %v785_v18, %v724_v57  ;;  %v796_v5 = vadd.f32 %v794_v60, %v768_v47 }
 0x4fc   :  { %v790_v14 = vadd.f32 %v786_v41, %v781_v63  ;;  %v747_v28 = vadd.f32 %v743_v29, %v738_v48  ;;  %v783_v42 = vadd.f32 %v779_v33, %v774_v62  ;;  %v797_v49 = vadd.f32 %v794_v60, %v769_v2 }
 0x4fd   :  { %799 = vrot.lane.b32.xlu0 %v744_v43, %s1412_s5  ;;  %821 = vrot.lane.b32.xlu1 %v791_v51, %s1413_s6  ;;  %v784_v1 = vadd.f32 %v780_v3, %v775_v7  ;;  %v795_v57 = vadd.f32 %v794_v60, %v767_v15  ;;  %v798_v36 = vadd.f32 %v794_v60, %v770_v54  ;;  %v2210_v60 = vld [vmem:[#allocation8_spill] sm:$0xff]  ;;  %vm1240_vm1 = vcmask 15360  }
 0x4fe   :  { %v792_v61 = vadd.f32 %v788_v38, %v783_v42 }
 0x4ff   :  { %v793_v20 = vadd.f32 %v789_v50, %v784_v1 }
 0x501   :  { %819 = vrot.lane.b32.xlu0 %v790_v14, %s1413_s6  ;;  %805 = vrot.lane.b32.xlu1 %v747_v28, %s1412_s5 }
 0x505   :  { %823 = vrot.lane.b32.xlu0 %v792_v61, %s1413_s6  ;;  %825 = vrot.lane.b32.xlu1 %v793_v20, %s1413_s6 }
 0x56b   :  { %v802_v4 = vpop.permute.xlu0 %801  ;;  %v804_v56 = vpop.permute.xlu1 %803 }
 0x56c   :  { %v808_v17 = vsel %vm346_vm11, %v802_v4, %v804_v56 }
 0x56d   :  { %v817_v23 = vadd.f32 %v808_v17, %v797_v49  ;;  %v1954_v17 = vsub.s32 3, %v2210_v60  ;;  %v1969_v49 = vld [vmem:[%s2204_s2 + $0x5] ss:$8 sm:$0xf] }
 0x56f   :  { %v800_v53 = vpop.permute.xlu0 %799  ;;  %v822_v6 = vpop.permute.xlu1 %821 }
 0x570   :  { %v809_v31 = vsel %vm346_vm11, %v800_v53, %v802_v4 }
 0x571   :  { %v816_v40 = vadd.f32 %v809_v31, %v796_v5  ;;  %v1948_v31 = vsub.s32 1, %v2210_v60  ;;  %v1959_v5 = vld [vmem:[%s2204_s2 + $0x6] ss:$8 sm:$0xf] }
 0x573   :  { %v820_v8 = vpop.permute.xlu0 %819  ;;  %v806_v18 = vpop.permute.xlu1 %805 }
 0x574   :  { %v810_v55 = vsel %vm346_vm11, %v806_v18, %v800_v53  ;;  %v807_v0 = vsel %vm346_vm11, %v804_v56, %v806_v18  ;;  %v829_v13 = vsel %vm367_vm12, %v820_v8, %v822_v6  ;;  %v1951_v18 = vsub.s32 2, %v2210_v60 }
 0x575   :  { %v811_v25 = vmul.f32 %v1625_v46, %v810_v55  ;;  %v818_v11 = vadd.f32 %v807_v0, %v798_v36  ;;  %v1964_v55 = vld [vmem:[%s2204_s2 + $0x4] ss:$8 sm:$0xf] }
 0x576   :  { %v1127_v0 = vrot.slane %v1959_v5, %v1951_v18  ;;  %v959_v36 = vrot.slane %v1964_v55, %v1948_v31 }
 0x577   :  { %v824_v32 = vpop.permute.xlu0 %823  ;;  %v815_v21 = vadd.f32 %v811_v25, %v795_v57  ;;  %v826_v39 = vpop.permute.xlu1 %825  ;;  %v1974_v25 = vld [vmem:[%s2204_s2] ss:$8 sm:$0xf] }
 0x578   :  { %v828_v9 = vsel %vm367_vm12, %v822_v6, %v824_v32  ;;  %v830_v10 = vsel %vm367_vm12, %v826_v39, %v820_v8  ;;  %v827_v46 = vsel %vm367_vm12, %v824_v32, %v826_v39  ;;  %v1945_v8 = vsub.s32 0, %v2210_v60 }
 0x579   :  { %v1908_v19 = vadd.f32 %v828_v9, %v816_v40  ;;  %v1910_v16 = vadd.f32 %v829_v13, %v815_v21  ;;  %v834_v58 = vmul.f32 0.0, %v830_v10  ;;  %v833_v45 = vmul.f32 %v1643_v24, %v827_v46  ;;  %v1995_v9 = vld [vmem:[%s2204_s2 + $0x7] ss:$8 sm:$0xf] }
 0x57a   :  { %v1119_v57 = vrot.slane %v1959_v5, %v1945_v8  ;;  %v1123_v40 = vrot.slane %v1959_v5, %v1948_v31  ;;  %v1131_v32 = vrot.slane %v1959_v5, %v1954_v17  ;;  %v963_v21 = vrot.slane %v1964_v55, %v1951_v18 }
 0x57b   :  { %v862_v52 = vmul.f32 %v1908_v19, %v1908_v19  ;;  %v846_v35 = vsel %vm386_vm15, %v1908_v19, 0.0  ;;  %v861_v12 = vmul.f32 %v1910_v16, %v1910_v16  ;;  %v838_v37 = vadd.f32 %v834_v58, %v818_v11 }
 0x57c   :  { %v1919_v27 = vadd.f32 %v833_v45, %v817_v23  ;;  %v845_v26 = vsel %vm386_vm15, %v1910_v16, 0.0  ;;  %v955_v23 = vrot.slane %v1964_v55, %v1945_v8  ;;  %v1037_v39 = vrot.slane %v1969_v49, %v1945_v8 }
 0x57d   :  { %v847_v44 = vadd.f32 %v846_v35, %v845_v26  ;;  %v866_v22 = vsel %vm386_vm15, %v862_v52, 0.0  ;;  %v1925_v24 = vmul.f32 %v1660_v59, %v838_v37  ;;  %v865_v43 = vsel %vm386_vm15, %v861_v12, 0.0  ;;  %v2015_v12 = vld [vmem:[%s2204_s2 + $0x2] ss:$8 sm:$0xf] }
 0x57e   :  { %v848_v34 = vsel %vm386_vm15, %v1919_v27, 0.0  ;;  %v863_v15 = vmul.f32 %v1919_v27, %v1919_v27  ;;  %v867_v2 = vadd.f32 %v866_v22, %v865_v43  ;;  %v1041_v10 = vrot.slane %v1969_v49, %v1948_v31 }
 0x57f   :  { %v849_v63 = vadd.f32 %v848_v34, %v847_v44  ;;  %v850_v47 = vsel %vm386_vm15, %v1925_v24, 0.0  ;;  %v864_v51 = vmul.f32 %v1925_v24, %v1925_v24  ;;  %v1045_v46 = vrot.slane %v1969_v49, %v1951_v18 }
 0x580   :  { %v868_v30 = vsel %vm386_vm15, %v863_v15, 0.0  ;;  %v918_v11 = vrot.slane %v1974_v25, %v1945_v8  ;;  %v967_v58 = vrot.slane %v1964_v55, %v1954_v17  ;;  %v1049_v45 = vrot.slane %v1969_v49, %v1954_v17 }
 0x581   :  { %v851_v29 = vadd.f32 %v850_v47, %v849_v63  ;;  %v869_v54 = vadd.f32 %v868_v30, %v867_v2  ;;  %v870_v62 = vsel %vm386_vm15, %v864_v51, 0.0  ;;  %v922_v52 = vrot.slane %v1974_v25, %v1948_v31  ;;  %v2033_v2 = vld [vmem:[%s2204_s2 + $0x1] ss:$8 sm:$0xf] }
 0x582   :  { %v926_v35 = vrot.slane %v1974_v25, %v1951_v18  ;;  %v930_v37 = vrot.slane %v1974_v25, %v1954_v17  ;;  %v1201_v26 = vrot.slane %v1995_v9, %v1945_v8  ;;  %v1205_v44 = vrot.slane %v1995_v9, %v1948_v31 }
 0x583   :  { %852 = vadd.xlane.f32.xlu0 %v851_v29  ;;  %v871_v41 = vadd.f32 %v870_v62, %v869_v54  ;;  %v1209_v22 = vrot.slane %v1995_v9, %v1951_v18  ;;  %v1213_v51 = vrot.slane %v1995_v9, %v1954_v17  ;;  %v1082_v30 = vrot.slane %v2015_v12, %v1945_v8 }
 0x584   :  { %v1090_v62 = vrot.slane %v2015_v12, %v1951_v18 }
 0x585   :  { %872 = vadd.xlane.f32.xlu1 %v871_v41  ;;  %v1094_v41 = vrot.slane %v2015_v12, %v1954_v17 }
 0x60c   :  { %v853_v7 = vpop.xlane.xlu0 %852 }
 0x60d   :  { %v854_v48 = vrot.slane %v853_v7, 4 }
 0x60e   :  { %v873_v14 = vpop.xlane.xlu1 %872 }
 0x60f   :  { %v855_v33 = vadd.f32 %v854_v48, %v853_v7  ;;  %v874_v38 = vrot.slane %v873_v14, 4  ;;  %v1000_v7 = vrot.slane %v2033_v2, %v1945_v8  ;;  %v1004_v48 = vrot.slane %v2033_v2, %v1948_v31 }
 0x611   :  { %v856_v28 = vrot.slane %v855_v33, 2  ;;  %v875_v3 = vadd.f32 %v874_v38, %v873_v14 }
 0x613   :  { %v876_v50 = vrot.slane %v875_v3, 2  ;;  %v857_v42 = vadd.f32 %v856_v28, %v855_v33 }
 0x615   :  { %v858_v1 = vrot.slane %v857_v42, 1  ;;  %v877_v61 = vadd.f32 %v876_v50, %v875_v3  ;;  %v1008_v3 = vrot.slane %v2033_v2, %v1951_v18  ;;  %v1012_v50 = vrot.slane %v2033_v2, %v1954_v17 }
 0x617   :  { %v859_v20 = vadd.f32 %v858_v1, %v857_v42  ;;  %v878_v4 = vrot.slane %v877_v61, 1 }
 0x619   :  { %1342 = vpush %v859_v20  ;;  %v879_v56 = vadd.f32 %v878_v4, %v877_v61 }
 0x61b   :  { %1344 = vpush %v879_v56 }
 0x64a   :  { %s1343_s1 = spop %1342 }
 0x64b   :  { %s1938_s5 = smul.f32 0.00125, %s1343_s1 }
 0x64c   :  { %s1345_s6 = spop %1344 }
 0x64d   :  { %s883_s29 = smul.f32 %s1938_s5, %s1938_s5 }
 0x64e   :  { %s882_s30 = smul.f32 0.00125, %s1345_s6  ;;  %s1313_s6 = sld [smem:[#allocation2 + $0x29]] }
 0x650   :  { %s884_s7 = ssub.f32 %s882_s30, %s883_s29 }
 0x651   :  { %s1321_s29 = sld [smem:[#allocation2 + $0x2b]] }
 0x652   :  { %s885_s8 = sadd.f32 1e-05, %s884_s7 }
 0x653   :  { %s1312_s30 = sld [smem:[#allocation2 + $0x25]] }
 0x654   :  { %v886_v53 = vstv %s885_s8  ;;  %s1308_s7 = sld [smem:[#allocation2 + $0x24]] }
 0x655   :  { %1361 = vrsqrt.f32 %v886_v53  ;;  %s1316_s8 = sld [smem:[#allocation2 + $0x26]] }
 0x662   :  { %v1362_v6 = vpop.eup %1361 }
 0x663   :  { %1346 = vpush %v1362_v6 }
 0x694   :  { %s1347_s17 = spop %1346 }
 0x695   :  { %s889_s20 = smul.f32 %s1347_s17, %s1305_s9  ;;  %s1320_s9 = sld [smem:[#allocation2 + $0x27]] }
 0x697   :  { %s890_s22 = smul.f32 %s889_s20, %s1938_s5  ;;  %v892_v13 = vstv %s889_s20  ;;  %s1309_s5 = sld [smem:[#allocation2 + $0x28]] }
 0x698   :  { %v893_v34 = vmul.f32 %v892_v13, %v1910_v16  ;;  %v894_v15 = vmul.f32 %v892_v13, %v1908_v19  ;;  %v895_v43 = vmul.f32 %v892_v13, %v1919_v27  ;;  %v896_v63 = vmul.f32 %v892_v13, %v1925_v24  ;;  %v2044_v24 = vld [vmem:[%s2204_s2 + $0x3] ss:$8 sm:$0xf]  ;;  %s1317_s2 = sld [smem:[#allocation2 + $0x2a]] }
 0x699   :  { %s891_s26 = ssub.f32 %s1942_s10, %s890_s22  ;;  %v1086_v16 = vrot.slane %v2015_v12, %v1948_v31  ;;  %v1164_v42 = vrot.slane %v2044_v24, %v1945_v8  ;;  %v1168_v1 = vrot.slane %v2044_v24, %v1948_v31  ;;  %v1172_v5 = vrot.slane %v2044_v24, %v1951_v18 }
 0x69b   :  { %v897_v47 = vstv %s891_s26 }
 0x69c   :  { %v898_v19 = vadd.f32 %v897_v47, %v893_v34  ;;  %v899_v29 = vadd.f32 %v897_v47, %v894_v15  ;;  %v900_v27 = vadd.f32 %v897_v47, %v895_v43  ;;  %v901_v54 = vadd.f32 %v897_v47, %v896_v63 }
 0x69e   :  { %v2054_v14 = vmax.f32 %v898_v19, 0.0  ;;  %v2056_v33 = vmax.f32 %v899_v29, 0.0  ;;  %v2058_v38 = vmax.f32 %v900_v27, 0.0  ;;  %v905_v28 = vmax.f32 %v901_v54, 0.0 }
 0x6a0   :  { %v2069_v61 = vmul.f32 %v1660_v59, %v905_v28  ;;  %v1136_v20 = vmul.f32 %v1119_v57, %v2054_v14  ;;  %v1137_v4 = vmul.f32 %v1123_v40, %v2056_v33  ;;  %v1138_v56 = vmul.f32 %v1127_v0, %v2058_v38 }
 0x6a1   :  { %v972_v53 = vmul.f32 %v955_v23, %v2054_v14  ;;  %v973_v6 = vmul.f32 %v959_v36, %v2056_v33  ;;  %v974_v60 = vmul.f32 %v963_v21, %v2058_v38  ;;  %v1054_v57 = vmul.f32 %v1037_v39, %v2054_v14 }
 0x6a2   :  { %v1139_v55 = vmul.f32 %v1131_v32, %v2069_v61  ;;  %v1140_v59 = vsel %vm386_vm15, %v1136_v20, 0.0  ;;  %v1141_v49 = vsel %vm386_vm15, %v1137_v4, 0.0  ;;  %v975_v0 = vmul.f32 %v967_v58, %v2069_v61 }
 0x6a3   :  { %v1142_v40 = vadd.f32 %v1141_v49, %v1140_v59  ;;  %v976_v23 = vsel %vm386_vm15, %v972_v53, 0.0  ;;  %v977_v36 = vsel %vm386_vm15, %v973_v6, 0.0  ;;  %v1143_v21 = vsel %vm386_vm15, %v1138_v56, 0.0 }
 0x6a4   :  { %v1145_v13 = vsel %vm386_vm15, %v1139_v55, 0.0  ;;  %v978_v34 = vadd.f32 %v977_v36, %v976_v23  ;;  %v1055_v32 = vmul.f32 %v1041_v10, %v2056_v33  ;;  %v979_v43 = vsel %vm386_vm15, %v974_v60, 0.0 }
 0x6a5   :  { %v1144_v15 = vadd.f32 %v1143_v21, %v1142_v40  ;;  %v1056_v63 = vmul.f32 %v1045_v46, %v2058_v38  ;;  %v1057_v39 = vmul.f32 %v1049_v45, %v2069_v61  ;;  %v1058_v58 = vsel %vm386_vm15, %v1054_v57, 0.0 }
 0x6a6   :  { %v980_v47 = vadd.f32 %v979_v43, %v978_v34  ;;  %v1059_v19 = vsel %vm386_vm15, %v1055_v32, 0.0  ;;  %v935_v29 = vmul.f32 %v918_v11, %v2054_v14  ;;  %v981_v10 = vsel %vm386_vm15, %v975_v0, 0.0 }
 0x6a7   :  { %v1146_v27 = vadd.f32 %v1145_v13, %v1144_v15  ;;  %v1060_v54 = vadd.f32 %v1059_v19, %v1058_v58  ;;  %v1061_v28 = vsel %vm386_vm15, %v1056_v63, 0.0  ;;  %v936_v46 = vmul.f32 %v922_v52, %v2056_v33 }
 0x6a8   :  { %v982_v20 = vadd.f32 %v981_v10, %v980_v47  ;;  %v937_v45 = vmul.f32 %v926_v35, %v2058_v38  ;;  %v938_v11 = vmul.f32 %v930_v37, %v2069_v61  ;;  %v939_v56 = vsel %vm386_vm15, %v935_v29, 0.0 }
 0x6a9   :  { %1147 = vadd.xlane.f32.xlu1 %v1146_v27  ;;  %v1062_v4 = vadd.f32 %v1061_v28, %v1060_v54  ;;  %v1218_v53 = vmul.f32 %v1201_v26, %v2054_v14  ;;  %v1219_v52 = vmul.f32 %v1205_v44, %v2056_v33  ;;  %v1063_v35 = vsel %vm386_vm15, %v1057_v39, 0.0 }
 0x6aa   :  { %983 = vadd.xlane.f32.xlu0 %v982_v20  ;;  %v940_v25 = vsel %vm386_vm15, %v936_v46, 0.0  ;;  %v942_v37 = vsel %vm386_vm15, %v937_v45, 0.0  ;;  %v1220_v6 = vmul.f32 %v1209_v22, %v2058_v38  ;;  %v944_v26 = vsel %vm386_vm15, %v938_v11, 0.0 }
 0x6ab   :  { %v1064_v60 = vadd.f32 %v1063_v35, %v1062_v4  ;;  %v941_v55 = vadd.f32 %v940_v25, %v939_v56  ;;  %v1222_v59 = vsel %vm386_vm15, %v1218_v53, 0.0  ;;  %v1221_v44 = vmul.f32 %v1213_v51, %v2069_v61 }
 0x6ac   :  { %v1223_v49 = vsel %vm386_vm15, %v1219_v52, 0.0  ;;  %v1099_v57 = vmul.f32 %v1082_v30, %v2054_v14  ;;  %v1100_v22 = vmul.f32 %v1086_v16, %v2056_v33  ;;  %v1225_v23 = vsel %vm386_vm15, %v1220_v6, 0.0 }
 0x6ad   :  { %v943_v40 = vadd.f32 %v942_v37, %v941_v55  ;;  %v1224_v0 = vadd.f32 %v1223_v49, %v1222_v59  ;;  %v1101_v9 = vmul.f32 %v1090_v62, %v2058_v38  ;;  %v1102_v51 = vmul.f32 %v1094_v41, %v2069_v61  ;;  %v910_v55 = vld [vmem:[%s2205_s3] sm:$0x3]  ;;  %s1414_s3 = smov [#allocation5]  }
 0x6ae   :  { %1065 = vadd.xlane.f32.xlu0 %v1064_v60  ;;  %v1103_v30 = vsel %vm386_vm15, %v1099_v57, 0.0  ;;  %v1104_v36 = vsel %vm386_vm15, %v1100_v22, 0.0  ;;  %v1017_v16 = vmul.f32 %v1000_v7, %v2054_v14  ;;  %v1176_v62 = vrot.slane %v2044_v24, %v1954_v17  ;;  %s1252_s12 = sshll.u32 %s1414_s3, 4  ;;  %s1253_s12 = int_to_ptr.vmem [resolvable:$true] %s1252_s12 }
 0x6af   :  { %v945_v21 = vadd.f32 %v944_v26, %v943_v40  ;;  %v1226_v13 = vadd.f32 %v1225_v23, %v1224_v0  ;;  %v1105_v34 = vadd.f32 %v1104_v36, %v1103_v30  ;;  %v1227_v32 = vsel %vm386_vm15, %v1221_v44, 0.0  ;;  %s1383_s13 = scalar_lea.vmem %s1253_s12, 32  ;;  %p1388_p6 = scmp.lt.s32.totalorder %s1253_s12, %s1253_s12 }
 0x6b0   :  { %v1106_v12 = vsel %vm386_vm15, %v1101_v9, 0.0  ;;  %v1018_v41 = vmul.f32 %v1004_v48, %v2056_v33  ;;  %v1019_v7 = vmul.f32 %v1008_v3, %v2058_v38  ;;  %v1021_v63 = vsel %vm386_vm15, %v1017_v16, 0.0  ;;  %p1384_p5 = scmp.ne.s32.totalorder %s1253_s12, %s1383_s13  ;;  %p1389_p7 = scmp.lt.s32.totalorder %s1383_s13, %s1383_s13 }
 0x6b1   :  { %946 = vadd.xlane.f32.xlu1 %v945_v21  ;;  %v1228_v15 = vadd.f32 %v1227_v32, %v1226_v13  ;;  %v1107_v43 = vadd.f32 %v1106_v12, %v1105_v34  ;;  %v1181_v39 = vmul.f32 %v1164_v42, %v2054_v14  ;;  %v1108_v47 = vsel %vm386_vm15, %v1102_v51, 0.0 }
 0x6b2   :  { %v1020_v48 = vmul.f32 %v1012_v50, %v2069_v61  ;;  %v1022_v58 = vsel %vm386_vm15, %v1018_v41, 0.0  ;;  %v1182_v3 = vmul.f32 %v1168_v1, %v2056_v33  ;;  %v1183_v8 = vmul.f32 %v1172_v5, %v2058_v38  ;;  %p1390_p8 = por %p1389_p7, %p1388_p6 }
 0x6b3   :  { %1229 = vadd.xlane.f32.xlu0 %v1228_v15  ;;  %v1109_v19 = vadd.f32 %v1108_v47, %v1107_v43  ;;  %v1023_v29 = vadd.f32 %v1022_v58, %v1021_v63  ;;  %v1024_v14 = vsel %vm386_vm15, %v1019_v7, 0.0  ;;  %v1185_v17 = vsel %vm386_vm15, %v1181_v39, 0.0 }
 0x6b4   :  { %v1186_v2 = vsel %vm386_vm15, %v1182_v3, 0.0  ;;  %v1026_v31 = vsel %vm386_vm15, %v1020_v48, 0.0  ;;  %v1184_v33 = vmul.f32 %v1176_v62, %v2069_v61  ;;  %v1188_v1 = vsel %vm386_vm15, %v1183_v8, 0.0  ;;  %p1391_p9 = pnand %p1390_p8, %p1384_p5 }
 0x6b5   :  { %1110 = vadd.xlane.f32.xlu1 %v1109_v19  ;;  %v1025_v50 = vadd.f32 %v1024_v14, %v1023_v29  ;;  %v1187_v42 = vadd.f32 %v1186_v2, %v1185_v17  ;;  %v1150_v38 = vstv %s1317_s2  ;;  %v986_v5 = vstv %s1309_s5 }
 0x6b6   :  { %v1190_v18 = vsel %vm386_vm15, %v1184_v33, 0.0  ;;  %v1068_v61 = vstv %s1313_s6  ;;  %v1232_v52 = vstv %s1321_s29  ;;  %v1031_v59 = vstv %s1312_s30 }
 0x6b7   :  { %v1027_v27 = vadd.f32 %v1026_v31, %v1025_v50  ;;  %v1189_v10 = vadd.f32 %v1188_v1, %v1187_v42  ;;  %v949_v49 = vstv %s1308_s7  ;;  %v1113_v9 = vstv %s1316_s8 }
 0x6b8   :  { %v1195_v16 = vstv %s1320_s9 }
 0x6b9   :  { %1028 = vadd.xlane.f32.xlu0 %v1027_v27  ;;  %v1191_v24 = vadd.f32 %v1190_v18, %v1189_v10 }
 0x6bd   :  { %1192 = vadd.xlane.f32.xlu0 %v1191_v24 }
 0x732   :  { %v1148_v54 = vpop.xlane.xlu1 %1147 }
 0x733   :  { %v1151_v28 = vadd.f32 %v1150_v38, %v1148_v54  ;;  %v984_v20 = vpop.xlane.xlu0 %983 }
 0x734   :  { %v987_v46 = vadd.f32 %v986_v5, %v984_v20 }
 0x735   :  { %v1152_v11 = vmul.f32 1.442695, %v1151_v28 }
 0x736   :  { %v988_v45 = vmul.f32 1.442695, %v987_v46 }
 0x737   :  { %v1066_v4 = vpop.xlane.xlu0 %1065 }
 0x738   :  { %v1069_v56 = vadd.f32 %v1068_v61, %v1066_v4  ;;  %1363 = vpow2.f32 %v988_v45 }
 0x739   :  { %1365 = vpow2.f32 %v1152_v11 }
 0x73a   :  { %v1070_v53 = vmul.f32 1.442695, %v1069_v56  ;;  %v947_v6 = vpop.xlane.xlu1 %946 }
 0x73b   :  { %v950_v23 = vadd.f32 %v949_v49, %v947_v6 }
 0x73c   :  { %1367 = vpow2.f32 %v1070_v53  ;;  %v1230_v35 = vpop.xlane.xlu0 %1229 }
 0x73d   :  { %v1233_v25 = vadd.f32 %v1232_v52, %v1230_v35 }
 0x73e   :  { %v1111_v51 = vpop.xlane.xlu1 %1110 }
 0x73f   :  { %v1234_v37 = vmul.f32 1.442695, %v1233_v25  ;;  %v1114_v62 = vadd.f32 %v1113_v9, %v1111_v51 }
 0x741   :  { %1369 = vpow2.f32 %v1234_v37 }
 0x742   :  { %v1029_v26 = vpop.xlane.xlu0 %1028 }
 0x743   :  { %v1032_v0 = vadd.f32 %v1031_v59, %v1029_v26 }
 0x745   :  { %v1364_v60 = vpop.eup %1363 }
 0x746   :  { %v1366_v44 = vpop.eup %1365  ;;  %v990_v22 = vmul.f32 %v1364_v60, %v910_v55  ;;  %v1193_v21 = vpop.xlane.xlu0 %1192 }
 0x747   :  { %v1154_v30 = vmul.f32 %v1366_v44, %v910_v55  ;;  %v1196_v12 = vadd.f32 %v1195_v16, %v1193_v21 }
 0x748   :  { %v991_v13 = vadd.f32 %v990_v22, %v950_v23 }
 0x749   :  { %v1368_v57 = vpop.eup %1367  ;;  %v1155_v7 = vadd.f32 %v1154_v30, %v1114_v62 }
 0x74a   :  { %v1072_v40 = vmul.f32 %v1368_v57, %v910_v55 }
 0x74c   :  { %v1073_v36 = vadd.f32 %v1072_v40, %v1032_v0 }
 0x74e   :  { %v1370_v34 = vpop.eup %1369  ;;  %v1239_v41 = vsel %vm1238_vm0, %v991_v13, %v1073_v36 }
 0x74f   :  { %v1236_v32 = vmul.f32 %v1370_v34, %v910_v55  ;;  %v1241_v43 = vsel %vm1240_vm1, %v1239_v41, %v1155_v7 }
 0x751   :  { %v1237_v15 = vadd.f32 %v1236_v32, %v1196_v12 }
 0x753   :  { %v1243_v63 = vsel %vm1242_vm2, %v1241_v43, %v1237_v15 }
 0x754   :  { %1245 = vst.msk [vmem:[#allocation5] sm:$0x3] %vm1244_vm3, %v1243_v63 }
 0x755   :  { %1394 = shalt.err (!%p1391_p9)
}
 0x756   :  { %1255 = dma.vmem_to_hbm [thread:$0]  %s1253_s12, 32, %s2206_s4, [#allocation3]  }
 0x757   :  { %1405 = dma.done.wait [#allocation3], 32  }
 0x758   :  { %1406 = vsyncadd [#allocation3], 4294967264 }
 0x759   :  { %1259 = vsyncpa [#allocation3], 1 }
 0x75a   :  { %1260 = vsyncpa [#allocation4], 1 }

</bundles_post_ra>
